<compile_context>
chip_gen: v7x
topology: tpu7x:2x2x1
jax: 0.10.0
libtpu: 0.0.40
codegen_flags: <defaults>
</compile_context>

<pallas_src>
import jax
import jax.numpy as jnp
from jax import lax
from jax.experimental import pallas as pl
from jax.experimental.pallas import tpu as pltpu

B = 2
CIN = 128          # model_in_channel
W_IN = 16          # spatial size
NUM_REQUIRE = 25
COORD = 4
EPS = 1e-5

OH = W_IN // 2     # 8
HW = OH * OH       # 64
KIN = CIN * 4      # 512  (cin * kh * kw for the 2x2 stride-2 conv)
C0, C1, C2 = 64, 32, 32
NSEG = HW // COORD          # 16 spatial quartets per output channel
CEMB = C2 * NSEG            # 512 = embed contraction length


# ---------------------------------------------------------------------------
# Fused kernel: conv block (3 x [matmul + BN-shift + ReLU]) + embed
# ---------------------------------------------------------------------------
def _fused_kernel(xp_ref, w0_ref, t0_ref, w1_ref, t1_ref, w2_ref, t2_ref,
                  we_ref, be_ref, o_ref):
    # Conv block, channels-LAST.  Activation rows are the conv output columns in
    # (j, b, l) order (j = spatial quartet index, l = coord within the quartet),
    # columns are output channels.  BN scale is already folded into the weights,
    # so only the per-channel shift + ReLU remain.
    h = jnp.dot(xp_ref[...], w0_ref[...], preferred_element_type=jnp.float32)
    h = jnp.maximum(h + t0_ref[...], 0.0)                       # conv0 + BN0 + ReLU
    h = jnp.dot(h.astype(jnp.bfloat16), w1_ref[...],
                preferred_element_type=jnp.float32)
    h = jnp.maximum(h + t1_ref[...], 0.0)                       # conv1 + BN1 + ReLU
    h = jnp.dot(h.astype(jnp.bfloat16), w2_ref[...],
                preferred_element_type=jnp.float32)
    h = jnp.maximum(h + t2_ref[...], 0.0)                       # conv2 + BN2 + ReLU
    hb = h.astype(jnp.bfloat16)                                  # (B*HW, C2)

    # Embed = Conv1d(512, 25, 1), expressed as 16 accumulated MXU dots over
    # vreg-aligned sublane slices -- no scratch, no lane scatter/gather:
    #   out_T[b*4 + l, o] = sum_j  hb[j*(B*4) + b*4 + l, :] @ we_stack[j][:, o]
    m = o_ref.shape[0]                                           # B*COORD
    acc = jnp.zeros((m, NUM_REQUIRE), jnp.float32)
    for j in range(NSEG):
        acc = acc + jnp.dot(hb[j * m:(j + 1) * m, :], we_ref[j],
                            preferred_element_type=jnp.float32)

    # Single lane-contiguous 2-D store; (B,25,4) reshape happens in the wrapper.
    o_ref[...] = acc + be_ref[...]


def box_embed_pallas(xp, w0, t0, w1, t1, w2, t2, we_stack, be_row, batch):
    rows = batch * HW

    def full(shape):
        return pl.BlockSpec(shape, lambda i, _s=shape: tuple(0 for _ in _s))

    return pl.pallas_call(
        _fused_kernel,
        out_shape=jax.ShapeDtypeStruct((batch * COORD, NUM_REQUIRE), jnp.float32),
        grid_spec=pltpu.PrefetchScalarGridSpec(
            num_scalar_prefetch=0,
            grid=(1,),
            in_specs=[
                full((rows, KIN)),                        # xp (bf16), channels-last
                full((KIN, C0)), full((1, C0)),           # conv0 weight / shift
                full((C0, C1)), full((1, C1)),            # conv1 weight / shift
                full((C1, C2)), full((1, C2)),            # conv2 weight / shift
                full((NSEG, C2, NUM_REQUIRE)),            # embed weight per quartet
                full((1, NUM_REQUIRE)),                   # embed bias row
            ],
            out_specs=full((batch * COORD, NUM_REQUIRE)),
        ),
        compiler_params=pltpu.CompilerParams(dimension_semantics=("arbitrary",)),
    )(xp, w0, t0, w1, t1, w2, t2, we_stack, be_row)


# ---------------------------------------------------------------------------
# Full forward (host glue is tiny / weight-side only, and fused under jit)
# ---------------------------------------------------------------------------
@jax.jit
def box_embed_forward(x, p):
    b = x.shape[0]

    # Space-to-depth patch matrix for the 2x2 / stride-2 conv, channels-last, with
    # rows already permuted to (j, b, l) order so the conv output lands directly
    # in the order the embed consumes:
    #   xp[(oh*2+owh)*b*4 + bi*4 + owl, cin*4 + kh*2 + kw]
    #       = x[bi, cin, 2*oh + kh, 8*owh + 2*owl + kw]
    xp = x.reshape(b, CIN, OH, 2, 2, COORD, 2)       # (b, cin, oh, kh, owh, owl, kw)
    xp = xp.transpose(2, 4, 0, 5, 1, 3, 6)           # (oh, owh, b, owl, cin, kh, kw)
    xp = xp.reshape(b * HW, KIN).astype(jnp.bfloat16)

    # Fold conv bias + inference-mode BN scale into the weights (in f32) plus a
    # per-channel shift row; cast the folded weights to bf16.
    def fold(w2d, bias, gamma, beta, mean, var):
        s = gamma / jnp.sqrt(var + EPS)
        t = beta - mean * s + bias * s
        wf = (w2d * s[:, None]).T.astype(jnp.bfloat16)          # (K, Cout)
        return wf, t.reshape(1, -1)

    w0, t0 = fold(p["w0"].reshape(C0, KIN), p["b0"], p["g0"], p["be0"], p["m0"], p["v0"])
    w1, t1 = fold(p["w1"].reshape(C1, C0), p["b1"], p["g1"], p["be1"], p["m1"], p["v1"])
    w2, t2 = fold(p["w2"].reshape(C2, C1), p["b2"], p["g2"], p["be2"], p["m2"], p["v2"])

    # Embed weight regrouped per spatial quartet j (PyTorch .view channel c = co*16 + j):
    #   we_stack[j, co, o] = we[o, co*16 + j]
    we_stack = p["we"][:, :, 0].reshape(NUM_REQUIRE, C2, NSEG)
    we_stack = we_stack.transpose(2, 1, 0).astype(jnp.bfloat16)
    be_row = p["be"].reshape(1, NUM_REQUIRE)

    out_t = box_embed_pallas(xp, w0, t0, w1, t1, w2, t2, we_stack, be_row, b)
    # out_t: (b*4, 25) with row = bi*4 + l  ->  (b, 25, 4)
    return out_t.reshape(b, COORD, NUM_REQUIRE).transpose(0, 2, 1)


# ---------------------------------------------------------------------------
# Pure-JAX reference (NCHW convs) for validation
# ---------------------------------------------------------------------------
def reference_forward(x, p):
    dn = ("NCHW", "OIHW", "NCHW")
    hp = lax.Precision.HIGHEST

    def bn_relu(y, bias, gamma, beta, mean, var):
        y = y + bias[None, :, None, None]
        y = (y - mean[None, :, None, None]) / jnp.sqrt(var + EPS)[None, :, None, None]
        y = y * gamma[None, :, None, None] + beta[None, :, None, None]
        return jnp.maximum(y, 0.0)

    y = lax.conv_general_dilated(x, p["w0"], (2, 2), "VALID", dimension_numbers=dn, precision=hp)
    y = bn_relu(y, p["b0"], p["g0"], p["be0"], p["m0"], p["v0"])
    y = lax.conv_general_dilated(y, p["w1"], (1, 1), "VALID", dimension_numbers=dn, precision=hp)
    y = bn_relu(y, p["b1"], p["g1"], p["be1"], p["m1"], p["v1"])
    y = lax.conv_general_dilated(y, p["w2"], (1, 1), "VALID", dimension_numbers=dn, precision=hp)
    y = bn_relu(y, p["b2"], p["g2"], p["be2"], p["m2"], p["v2"])
    y = y.reshape(y.shape[0], -1, COORD)                                  # (b, 512, 4)
    out = jnp.einsum("oc,bcl->bol", p["we"][:, :, 0], y, precision=hp)
    return out + p["be"][None, :, None]


# ---------------------------------------------------------------------------
if __name__ == "__main__":
    key = jax.random.PRNGKey(0)
    ks = jax.random.split(key, 24)

    def nrm(k, shape, scale=0.05):
        return scale * jax.random.normal(k, shape, jnp.float32)

    params = {
        # conv0: Conv2d(128, 64, 2, 2)
        "w0": nrm(ks[0], (C0, CIN, 2, 2)), "b0": nrm(ks[1], (C0,)),
        "g0": 1.0 + nrm(ks[2], (C0,)), "be0": nrm(ks[3], (C0,)),
        "m0": nrm(ks[4], (C0,)), "v0": jax.random.uniform(ks[5], (C0,), jnp.float32, 0.5, 1.5),
        # conv1: Conv2d(64, 32, 1, 1)
        "w1": nrm(ks[6], (C1, C0, 1, 1)), "b1": nrm(ks[7], (C1,)),
        "g1": 1.0 + nrm(ks[8], (C1,)), "be1": nrm(ks[9], (C1,)),
        "m1": nrm(ks[10], (C1,)), "v1": jax.random.uniform(ks[11], (C1,), jnp.float32, 0.5, 1.5),
        # conv2: Conv2d(32, 32, 1, 1)
        "w2": nrm(ks[12], (C2, C1, 1, 1)), "b2": nrm(ks[13], (C2,)),
        "g2": 1.0 + nrm(ks[14], (C2,)), "be2": nrm(ks[15], (C2,)),
        "m2": nrm(ks[16], (C2,)), "v2": jax.random.uniform(ks[17], (C2,), jnp.float32, 0.5, 1.5),
        # embed: Conv1d(512, 25, 1)
        "we": nrm(ks[18], (NUM_REQUIRE, 512, 1)), "be": nrm(ks[19], (NUM_REQUIRE,)),
    }

    x = jax.random.normal(ks[20], (B, CIN, W_IN, W_IN), jnp.float32)

    out = jax.block_until_ready(box_embed_forward(x, params))
    ref = jax.block_until_ready(reference_forward(x, params))

    assert out.shape == (B, NUM_REQUIRE, COORD), out.shape
    assert jnp.all(jnp.isfinite(out))
    # NOTE: conv and embed operands are bf16 (f32 accumulation) vs. the f32 HIGHEST
    # reference, hence the loose 2e-2 tolerance (inference-grade parity).
    assert jnp.allclose(out, ref, rtol=2e-2, atol=2e-2), float(jnp.max(jnp.abs(out - ref)))

    print("KERNEL_OK")
</pallas_src>

<mosaic_0001>
module attributes {stable_mosaic.version = 11 : i64} {
  func.func @_fused_kernel(%arg0: i32, %arg1: memref<128x512xbf16, #tpu.memory_space<vmem>>, %arg2: memref<512x64xbf16, #tpu.memory_space<vmem>>, %arg3: memref<1x64xf32, #tpu.memory_space<vmem>>, %arg4: memref<64x32xbf16, #tpu.memory_space<vmem>>, %arg5: memref<1x32xf32, #tpu.memory_space<vmem>>, %arg6: memref<32x32xbf16, #tpu.memory_space<vmem>>, %arg7: memref<1x32xf32, #tpu.memory_space<vmem>>, %arg8: memref<16x32x25xbf16, #tpu.memory_space<vmem>>, %arg9: memref<1x25xf32, #tpu.memory_space<vmem>>, %arg10: memref<8x25xf32, #tpu.memory_space<vmem>>) attributes {dimension_semantics = [#tpu.dimension_semantics<arbitrary>], iteration_bounds = array<i64: 1>, scalar_prefetch = 0 : i64, scratch_operands = 0 : i64, tpu.core_type = #tpu.core_type<tc>, window_params = [{pipeline_mode = #tpu.pipeline_mode<synchronous>, transform_indices = @transform_0, window_bounds = array<i64: 128, 512>}, {pipeline_mode = #tpu.pipeline_mode<synchronous>, transform_indices = @transform_1, window_bounds = array<i64: 512, 64>}, {pipeline_mode = #tpu.pipeline_mode<synchronous>, transform_indices = @transform_2, window_bounds = array<i64: 1, 64>}, {pipeline_mode = #tpu.pipeline_mode<synchronous>, transform_indices = @transform_3, window_bounds = array<i64: 64, 32>}, {pipeline_mode = #tpu.pipeline_mode<synchronous>, transform_indices = @transform_4, window_bounds = array<i64: 1, 32>}, {pipeline_mode = #tpu.pipeline_mode<synchronous>, transform_indices = @transform_5, window_bounds = array<i64: 32, 32>}, {pipeline_mode = #tpu.pipeline_mode<synchronous>, transform_indices = @transform_6, window_bounds = array<i64: 1, 32>}, {pipeline_mode = #tpu.pipeline_mode<synchronous>, transform_indices = @transform_7, window_bounds = array<i64: 16, 32, 25>}, {pipeline_mode = #tpu.pipeline_mode<synchronous>, transform_indices = @transform_8, window_bounds = array<i64: 1, 25>}, {pipeline_mode = #tpu.pipeline_mode<synchronous>, transform_indices = @transform_9, window_bounds = array<i64: 8, 25>}]} {
    %c0 = arith.constant 0 : index
    %c0_0 = arith.constant 0 : index
    %0 = vector.load %arg1[%c0, %c0_0] : memref<128x512xbf16, #tpu.memory_space<vmem>>, vector<128x512xbf16>
    %c0_1 = arith.constant 0 : index
    %c0_2 = arith.constant 0 : index
    %1 = vector.load %arg2[%c0_1, %c0_2] : memref<512x64xbf16, #tpu.memory_space<vmem>>, vector<512x64xbf16>
    %cst = arith.constant dense<0.000000e+00> : vector<128x64xf32>
    %2 = tpu.matmul %0, %1, %cst {dimension_numbers = #tpu.dot_dimension_numbers<[1], [0], [0], [1], [0, 0, 1, 1], [], []>} : vector<128x512xbf16>, vector<512x64xbf16>, vector<128x64xf32> -> vector<128x64xf32>
    %c0_3 = arith.constant 0 : index
    %c0_4 = arith.constant 0 : index
    %3 = vector.load %arg3[%c0_3, %c0_4] : memref<1x64xf32, #tpu.memory_space<vmem>>, vector<1x64xf32>
    %4 = vector.broadcast %3 : vector<1x64xf32> to vector<128x64xf32>
    %5 = arith.addf %2, %4 : vector<128x64xf32>
    %cst_5 = arith.constant 0.000000e+00 : f32
    %6 = vector.broadcast %cst_5 : f32 to vector<128x64xf32>
    %7 = arith.maximumf %5, %6 : vector<128x64xf32>
    %8 = arith.truncf %7 : vector<128x64xf32> to vector<128x64xbf16>
    %c0_6 = arith.constant 0 : index
    %c0_7 = arith.constant 0 : index
    %9 = vector.load %arg4[%c0_6, %c0_7] : memref<64x32xbf16, #tpu.memory_space<vmem>>, vector<64x32xbf16>
    %cst_8 = arith.constant dense<0.000000e+00> : vector<128x32xf32>
    %10 = tpu.matmul %8, %9, %cst_8 {dimension_numbers = #tpu.dot_dimension_numbers<[1], [0], [0], [1], [0, 0, 1, 1], [], []>} : vector<128x64xbf16>, vector<64x32xbf16>, vector<128x32xf32> -> vector<128x32xf32>
    %c0_9 = arith.constant 0 : index
    %c0_10 = arith.constant 0 : index
    %11 = vector.load %arg5[%c0_9, %c0_10] : memref<1x32xf32, #tpu.memory_space<vmem>>, vector<1x32xf32>
    %12 = vector.broadcast %11 : vector<1x32xf32> to vector<128x32xf32>
    %13 = arith.addf %10, %12 : vector<128x32xf32>
    %cst_11 = arith.constant 0.000000e+00 : f32
    %14 = vector.broadcast %cst_11 : f32 to vector<128x32xf32>
    %15 = arith.maximumf %13, %14 : vector<128x32xf32>
    %16 = arith.truncf %15 : vector<128x32xf32> to vector<128x32xbf16>
    %c0_12 = arith.constant 0 : index
    %c0_13 = arith.constant 0 : index
    %17 = vector.load %arg6[%c0_12, %c0_13] : memref<32x32xbf16, #tpu.memory_space<vmem>>, vector<32x32xbf16>
    %cst_14 = arith.constant dense<0.000000e+00> : vector<128x32xf32>
    %18 = tpu.matmul %16, %17, %cst_14 {dimension_numbers = #tpu.dot_dimension_numbers<[1], [0], [0], [1], [0, 0, 1, 1], [], []>} : vector<128x32xbf16>, vector<32x32xbf16>, vector<128x32xf32> -> vector<128x32xf32>
    %c0_15 = arith.constant 0 : index
    %c0_16 = arith.constant 0 : index
    %19 = vector.load %arg7[%c0_15, %c0_16] : memref<1x32xf32, #tpu.memory_space<vmem>>, vector<1x32xf32>
    %20 = vector.broadcast %19 : vector<1x32xf32> to vector<128x32xf32>
    %21 = arith.addf %18, %20 : vector<128x32xf32>
    %cst_17 = arith.constant 0.000000e+00 : f32
    %22 = vector.broadcast %cst_17 : f32 to vector<128x32xf32>
    %23 = arith.maximumf %21, %22 : vector<128x32xf32>
    %24 = arith.truncf %23 : vector<128x32xf32> to vector<128x32xbf16>
    %cst_18 = arith.constant 0.000000e+00 : f32
    %25 = vector.broadcast %cst_18 : f32 to vector<8x25xf32>
    %26 = vector.extract_strided_slice %24 {offsets = [0, 0], sizes = [8, 32], strides = [1, 1]} : vector<128x32xbf16> to vector<8x32xbf16>
    %c0_19 = arith.constant 0 : index
    %c0_20 = arith.constant 0 : index
    %c0_21 = arith.constant 0 : index
    %27 = vector.load %arg8[%c0_19, %c0_20, %c0_21] : memref<16x32x25xbf16, #tpu.memory_space<vmem>>, vector<1x32x25xbf16>
    %28 = vector.shape_cast %27 : vector<1x32x25xbf16> to vector<32x25xbf16>
    %cst_22 = arith.constant dense<0.000000e+00> : vector<8x25xf32>
    %29 = tpu.matmul %26, %28, %cst_22 {dimension_numbers = #tpu.dot_dimension_numbers<[1], [0], [0], [1], [0, 0, 1, 1], [], []>} : vector<8x32xbf16>, vector<32x25xbf16>, vector<8x25xf32> -> vector<8x25xf32>
    %30 = arith.addf %25, %29 : vector<8x25xf32>
    %31 = vector.extract_strided_slice %24 {offsets = [8, 0], sizes = [8, 32], strides = [1, 1]} : vector<128x32xbf16> to vector<8x32xbf16>
    %c1 = arith.constant 1 : index
    %c0_23 = arith.constant 0 : index
    %c0_24 = arith.constant 0 : index
    %32 = vector.load %arg8[%c1, %c0_23, %c0_24] : memref<16x32x25xbf16, #tpu.memory_space<vmem>>, vector<1x32x25xbf16>
    %33 = vector.shape_cast %32 : vector<1x32x25xbf16> to vector<32x25xbf16>
    %cst_25 = arith.constant dense<0.000000e+00> : vector<8x25xf32>
    %34 = tpu.matmul %31, %33, %cst_25 {dimension_numbers = #tpu.dot_dimension_numbers<[1], [0], [0], [1], [0, 0, 1, 1], [], []>} : vector<8x32xbf16>, vector<32x25xbf16>, vector<8x25xf32> -> vector<8x25xf32>
    %35 = arith.addf %30, %34 : vector<8x25xf32>
    %36 = vector.extract_strided_slice %24 {offsets = [16, 0], sizes = [8, 32], strides = [1, 1]} : vector<128x32xbf16> to vector<8x32xbf16>
    %c2 = arith.constant 2 : index
    %c0_26 = arith.constant 0 : index
    %c0_27 = arith.constant 0 : index
    %37 = vector.load %arg8[%c2, %c0_26, %c0_27] : memref<16x32x25xbf16, #tpu.memory_space<vmem>>, vector<1x32x25xbf16>
    %38 = vector.shape_cast %37 : vector<1x32x25xbf16> to vector<32x25xbf16>
    %cst_28 = arith.constant dense<0.000000e+00> : vector<8x25xf32>
    %39 = tpu.matmul %36, %38, %cst_28 {dimension_numbers = #tpu.dot_dimension_numbers<[1], [0], [0], [1], [0, 0, 1, 1], [], []>} : vector<8x32xbf16>, vector<32x25xbf16>, vector<8x25xf32> -> vector<8x25xf32>
    %40 = arith.addf %35, %39 : vector<8x25xf32>
    %41 = vector.extract_strided_slice %24 {offsets = [24, 0], sizes = [8, 32], strides = [1, 1]} : vector<128x32xbf16> to vector<8x32xbf16>
    %c3 = arith.constant 3 : index
    %c0_29 = arith.constant 0 : index
    %c0_30 = arith.constant 0 : index
    %42 = vector.load %arg8[%c3, %c0_29, %c0_30] : memref<16x32x25xbf16, #tpu.memory_space<vmem>>, vector<1x32x25xbf16>
    %43 = vector.shape_cast %42 : vector<1x32x25xbf16> to vector<32x25xbf16>
    %cst_31 = arith.constant dense<0.000000e+00> : vector<8x25xf32>
    %44 = tpu.matmul %41, %43, %cst_31 {dimension_numbers = #tpu.dot_dimension_numbers<[1], [0], [0], [1], [0, 0, 1, 1], [], []>} : vector<8x32xbf16>, vector<32x25xbf16>, vector<8x25xf32> -> vector<8x25xf32>
    %45 = arith.addf %40, %44 : vector<8x25xf32>
    %46 = vector.extract_strided_slice %24 {offsets = [32, 0], sizes = [8, 32], strides = [1, 1]} : vector<128x32xbf16> to vector<8x32xbf16>
    %c4 = arith.constant 4 : index
    %c0_32 = arith.constant 0 : index
    %c0_33 = arith.constant 0 : index
    %47 = vector.load %arg8[%c4, %c0_32, %c0_33] : memref<16x32x25xbf16, #tpu.memory_space<vmem>>, vector<1x32x25xbf16>
    %48 = vector.shape_cast %47 : vector<1x32x25xbf16> to vector<32x25xbf16>
    %cst_34 = arith.constant dense<0.000000e+00> : vector<8x25xf32>
    %49 = tpu.matmul %46, %48, %cst_34 {dimension_numbers = #tpu.dot_dimension_numbers<[1], [0], [0], [1], [0, 0, 1, 1], [], []>} : vector<8x32xbf16>, vector<32x25xbf16>, vector<8x25xf32> -> vector<8x25xf32>
    %50 = arith.addf %45, %49 : vector<8x25xf32>
    %51 = vector.extract_strided_slice %24 {offsets = [40, 0], sizes = [8, 32], strides = [1, 1]} : vector<128x32xbf16> to vector<8x32xbf16>
    %c5 = arith.constant 5 : index
    %c0_35 = arith.constant 0 : index
    %c0_36 = arith.constant 0 : index
    %52 = vector.load %arg8[%c5, %c0_35, %c0_36] : memref<16x32x25xbf16, #tpu.memory_space<vmem>>, vector<1x32x25xbf16>
    %53 = vector.shape_cast %52 : vector<1x32x25xbf16> to vector<32x25xbf16>
    %cst_37 = arith.constant dense<0.000000e+00> : vector<8x25xf32>
    %54 = tpu.matmul %51, %53, %cst_37 {dimension_numbers = #tpu.dot_dimension_numbers<[1], [0], [0], [1], [0, 0, 1, 1], [], []>} : vector<8x32xbf16>, vector<32x25xbf16>, vector<8x25xf32> -> vector<8x25xf32>
    %55 = arith.addf %50, %54 : vector<8x25xf32>
    %56 = vector.extract_strided_slice %24 {offsets = [48, 0], sizes = [8, 32], strides = [1, 1]} : vector<128x32xbf16> to vector<8x32xbf16>
    %c6 = arith.constant 6 : index
    %c0_38 = arith.constant 0 : index
    %c0_39 = arith.constant 0 : index
    %57 = vector.load %arg8[%c6, %c0_38, %c0_39] : memref<16x32x25xbf16, #tpu.memory_space<vmem>>, vector<1x32x25xbf16>
    %58 = vector.shape_cast %57 : vector<1x32x25xbf16> to vector<32x25xbf16>
    %cst_40 = arith.constant dense<0.000000e+00> : vector<8x25xf32>
    %59 = tpu.matmul %56, %58, %cst_40 {dimension_numbers = #tpu.dot_dimension_numbers<[1], [0], [0], [1], [0, 0, 1, 1], [], []>} : vector<8x32xbf16>, vector<32x25xbf16>, vector<8x25xf32> -> vector<8x25xf32>
    %60 = arith.addf %55, %59 : vector<8x25xf32>
    %61 = vector.extract_strided_slice %24 {offsets = [56, 0], sizes = [8, 32], strides = [1, 1]} : vector<128x32xbf16> to vector<8x32xbf16>
    %c7 = arith.constant 7 : index
    %c0_41 = arith.constant 0 : index
    %c0_42 = arith.constant 0 : index
    %62 = vector.load %arg8[%c7, %c0_41, %c0_42] : memref<16x32x25xbf16, #tpu.memory_space<vmem>>, vector<1x32x25xbf16>
    %63 = vector.shape_cast %62 : vector<1x32x25xbf16> to vector<32x25xbf16>
    %cst_43 = arith.constant dense<0.000000e+00> : vector<8x25xf32>
    %64 = tpu.matmul %61, %63, %cst_43 {dimension_numbers = #tpu.dot_dimension_numbers<[1], [0], [0], [1], [0, 0, 1, 1], [], []>} : vector<8x32xbf16>, vector<32x25xbf16>, vector<8x25xf32> -> vector<8x25xf32>
    %65 = arith.addf %60, %64 : vector<8x25xf32>
    %66 = vector.extract_strided_slice %24 {offsets = [64, 0], sizes = [8, 32], strides = [1, 1]} : vector<128x32xbf16> to vector<8x32xbf16>
    %c8 = arith.constant 8 : index
    %c0_44 = arith.constant 0 : index
    %c0_45 = arith.constant 0 : index
    %67 = vector.load %arg8[%c8, %c0_44, %c0_45] : memref<16x32x25xbf16, #tpu.memory_space<vmem>>, vector<1x32x25xbf16>
    %68 = vector.shape_cast %67 : vector<1x32x25xbf16> to vector<32x25xbf16>
    %cst_46 = arith.constant dense<0.000000e+00> : vector<8x25xf32>
    %69 = tpu.matmul %66, %68, %cst_46 {dimension_numbers = #tpu.dot_dimension_numbers<[1], [0], [0], [1], [0, 0, 1, 1], [], []>} : vector<8x32xbf16>, vector<32x25xbf16>, vector<8x25xf32> -> vector<8x25xf32>
    %70 = arith.addf %65, %69 : vector<8x25xf32>
    %71 = vector.extract_strided_slice %24 {offsets = [72, 0], sizes = [8, 32], strides = [1, 1]} : vector<128x32xbf16> to vector<8x32xbf16>
    %c9 = arith.constant 9 : index
    %c0_47 = arith.constant 0 : index
    %c0_48 = arith.constant 0 : index
    %72 = vector.load %arg8[%c9, %c0_47, %c0_48] : memref<16x32x25xbf16, #tpu.memory_space<vmem>>, vector<1x32x25xbf16>
    %73 = vector.shape_cast %72 : vector<1x32x25xbf16> to vector<32x25xbf16>
    %cst_49 = arith.constant dense<0.000000e+00> : vector<8x25xf32>
    %74 = tpu.matmul %71, %73, %cst_49 {dimension_numbers = #tpu.dot_dimension_numbers<[1], [0], [0], [1], [0, 0, 1, 1], [], []>} : vector<8x32xbf16>, vector<32x25xbf16>, vector<8x25xf32> -> vector<8x25xf32>
    %75 = arith.addf %70, %74 : vector<8x25xf32>
    %76 = vector.extract_strided_slice %24 {offsets = [80, 0], sizes = [8, 32], strides = [1, 1]} : vector<128x32xbf16> to vector<8x32xbf16>
    %c10 = arith.constant 10 : index
    %c0_50 = arith.constant 0 : index
    %c0_51 = arith.constant 0 : index
    %77 = vector.load %arg8[%c10, %c0_50, %c0_51] : memref<16x32x25xbf16, #tpu.memory_space<vmem>>, vector<1x32x25xbf16>
    %78 = vector.shape_cast %77 : vector<1x32x25xbf16> to vector<32x25xbf16>
    %cst_52 = arith.constant dense<0.000000e+00> : vector<8x25xf32>
    %79 = tpu.matmul %76, %78, %cst_52 {dimension_numbers = #tpu.dot_dimension_numbers<[1], [0], [0], [1], [0, 0, 1, 1], [], []>} : vector<8x32xbf16>, vector<32x25xbf16>, vector<8x25xf32> -> vector<8x25xf32>
    %80 = arith.addf %75, %79 : vector<8x25xf32>
    %81 = vector.extract_strided_slice %24 {offsets = [88, 0], sizes = [8, 32], strides = [1, 1]} : vector<128x32xbf16> to vector<8x32xbf16>
    %c11 = arith.constant 11 : index
    %c0_53 = arith.constant 0 : index
    %c0_54 = arith.constant 0 : index
    %82 = vector.load %arg8[%c11, %c0_53, %c0_54] : memref<16x32x25xbf16, #tpu.memory_space<vmem>>, vector<1x32x25xbf16>
    %83 = vector.shape_cast %82 : vector<1x32x25xbf16> to vector<32x25xbf16>
    %cst_55 = arith.constant dense<0.000000e+00> : vector<8x25xf32>
    %84 = tpu.matmul %81, %83, %cst_55 {dimension_numbers = #tpu.dot_dimension_numbers<[1], [0], [0], [1], [0, 0, 1, 1], [], []>} : vector<8x32xbf16>, vector<32x25xbf16>, vector<8x25xf32> -> vector<8x25xf32>
    %85 = arith.addf %80, %84 : vector<8x25xf32>
    %86 = vector.extract_strided_slice %24 {offsets = [96, 0], sizes = [8, 32], strides = [1, 1]} : vector<128x32xbf16> to vector<8x32xbf16>
    %c12 = arith.constant 12 : index
    %c0_56 = arith.constant 0 : index
    %c0_57 = arith.constant 0 : index
    %87 = vector.load %arg8[%c12, %c0_56, %c0_57] : memref<16x32x25xbf16, #tpu.memory_space<vmem>>, vector<1x32x25xbf16>
    %88 = vector.shape_cast %87 : vector<1x32x25xbf16> to vector<32x25xbf16>
    %cst_58 = arith.constant dense<0.000000e+00> : vector<8x25xf32>
    %89 = tpu.matmul %86, %88, %cst_58 {dimension_numbers = #tpu.dot_dimension_numbers<[1], [0], [0], [1], [0, 0, 1, 1], [], []>} : vector<8x32xbf16>, vector<32x25xbf16>, vector<8x25xf32> -> vector<8x25xf32>
    %90 = arith.addf %85, %89 : vector<8x25xf32>
    %91 = vector.extract_strided_slice %24 {offsets = [104, 0], sizes = [8, 32], strides = [1, 1]} : vector<128x32xbf16> to vector<8x32xbf16>
    %c13 = arith.constant 13 : index
    %c0_59 = arith.constant 0 : index
    %c0_60 = arith.constant 0 : index
    %92 = vector.load %arg8[%c13, %c0_59, %c0_60] : memref<16x32x25xbf16, #tpu.memory_space<vmem>>, vector<1x32x25xbf16>
    %93 = vector.shape_cast %92 : vector<1x32x25xbf16> to vector<32x25xbf16>
    %cst_61 = arith.constant dense<0.000000e+00> : vector<8x25xf32>
    %94 = tpu.matmul %91, %93, %cst_61 {dimension_numbers = #tpu.dot_dimension_numbers<[1], [0], [0], [1], [0, 0, 1, 1], [], []>} : vector<8x32xbf16>, vector<32x25xbf16>, vector<8x25xf32> -> vector<8x25xf32>
    %95 = arith.addf %90, %94 : vector<8x25xf32>
    %96 = vector.extract_strided_slice %24 {offsets = [112, 0], sizes = [8, 32], strides = [1, 1]} : vector<128x32xbf16> to vector<8x32xbf16>
    %c14 = arith.constant 14 : index
    %c0_62 = arith.constant 0 : index
    %c0_63 = arith.constant 0 : index
    %97 = vector.load %arg8[%c14, %c0_62, %c0_63] : memref<16x32x25xbf16, #tpu.memory_space<vmem>>, vector<1x32x25xbf16>
    %98 = vector.shape_cast %97 : vector<1x32x25xbf16> to vector<32x25xbf16>
    %cst_64 = arith.constant dense<0.000000e+00> : vector<8x25xf32>
    %99 = tpu.matmul %96, %98, %cst_64 {dimension_numbers = #tpu.dot_dimension_numbers<[1], [0], [0], [1], [0, 0, 1, 1], [], []>} : vector<8x32xbf16>, vector<32x25xbf16>, vector<8x25xf32> -> vector<8x25xf32>
    %100 = arith.addf %95, %99 : vector<8x25xf32>
    %101 = vector.extract_strided_slice %24 {offsets = [120, 0], sizes = [8, 32], strides = [1, 1]} : vector<128x32xbf16> to vector<8x32xbf16>
    %c15 = arith.constant 15 : index
    %c0_65 = arith.constant 0 : index
    %c0_66 = arith.constant 0 : index
    %102 = vector.load %arg8[%c15, %c0_65, %c0_66] : memref<16x32x25xbf16, #tpu.memory_space<vmem>>, vector<1x32x25xbf16>
    %103 = vector.shape_cast %102 : vector<1x32x25xbf16> to vector<32x25xbf16>
    %cst_67 = arith.constant dense<0.000000e+00> : vector<8x25xf32>
    %104 = tpu.matmul %101, %103, %cst_67 {dimension_numbers = #tpu.dot_dimension_numbers<[1], [0], [0], [1], [0, 0, 1, 1], [], []>} : vector<8x32xbf16>, vector<32x25xbf16>, vector<8x25xf32> -> vector<8x25xf32>
    %105 = arith.addf %100, %104 : vector<8x25xf32>
    %c0_68 = arith.constant 0 : index
    %c0_69 = arith.constant 0 : index
    %106 = vector.load %arg9[%c0_68, %c0_69] : memref<1x25xf32, #tpu.memory_space<vmem>>, vector<1x25xf32>
    %107 = vector.broadcast %106 : vector<1x25xf32> to vector<8x25xf32>
    %108 = arith.addf %105, %107 : vector<8x25xf32>
    %c0_70 = arith.constant 0 : index
    %c0_71 = arith.constant 0 : index
    %109 = vector.load %arg10[%c0_70, %c0_71] : memref<8x25xf32, #tpu.memory_space<vmem>>, vector<8x25xf32>
    tpu.vector_store %arg10[%c0_70, %c0_71], %108 {strides = array<i32>} : memref<8x25xf32, #tpu.memory_space<vmem>>, vector<8x25xf32>,
    return
  }
  func.func @transform_0(%arg0: i32) -> (i32, i32) {
    %c0_i32 = arith.constant 0 : i32
    %c0_i32_0 = arith.constant 0 : i32
    %c0_i32_1 = arith.constant 0 : i32
    return %c0_i32, %c0_i32_0 : i32, i32
  }
  func.func @transform_1(%arg0: i32) -> (i32, i32) {
    %c0_i32 = arith.constant 0 : i32
    %c0_i32_0 = arith.constant 0 : i32
    %c0_i32_1 = arith.constant 0 : i32
    return %c0_i32, %c0_i32_0 : i32, i32
  }
  func.func @transform_2(%arg0: i32) -> (i32, i32) {
    %c0_i32 = arith.constant 0 : i32
    %c0_i32_0 = arith.constant 0 : i32
    %c0_i32_1 = arith.constant 0 : i32
    return %c0_i32, %c0_i32_0 : i32, i32
  }
  func.func @transform_3(%arg0: i32) -> (i32, i32) {
    %c0_i32 = arith.constant 0 : i32
    %c0_i32_0 = arith.constant 0 : i32
    %c0_i32_1 = arith.constant 0 : i32
    return %c0_i32, %c0_i32_0 : i32, i32
  }
  func.func @transform_4(%arg0: i32) -> (i32, i32) {
    %c0_i32 = arith.constant 0 : i32
    %c0_i32_0 = arith.constant 0 : i32
    %c0_i32_1 = arith.constant 0 : i32
    return %c0_i32, %c0_i32_0 : i32, i32
  }
  func.func @transform_5(%arg0: i32) -> (i32, i32) {
    %c0_i32 = arith.constant 0 : i32
    %c0_i32_0 = arith.constant 0 : i32
    %c0_i32_1 = arith.constant 0 : i32
    return %c0_i32, %c0_i32_0 : i32, i32
  }
  func.func @transform_6(%arg0: i32) -> (i32, i32) {
    %c0_i32 = arith.constant 0 : i32
    %c0_i32_0 = arith.constant 0 : i32
    %c0_i32_1 = arith.constant 0 : i32
    return %c0_i32, %c0_i32_0 : i32, i32
  }
  func.func @transform_7(%arg0: i32) -> (i32, i32, i32) {
    %c0_i32 = arith.constant 0 : i32
    %c0_i32_0 = arith.constant 0 : i32
    %c0_i32_1 = arith.constant 0 : i32
    %c0_i32_2 = arith.constant 0 : i32
    return %c0_i32, %c0_i32_0, %c0_i32_1 : i32, i32, i32
  }
  func.func @transform_8(%arg0: i32) -> (i32, i32) {
    %c0_i32 = arith.constant 0 : i32
    %c0_i32_0 = arith.constant 0 : i32
    %c0_i32_1 = arith.constant 0 : i32
    return %c0_i32, %c0_i32_0 : i32, i32
  }
  func.func @transform_9(%arg0: i32) -> (i32, i32) {
    %c0_i32 = arith.constant 0 : i32
    %c0_i32_0 = arith.constant 0 : i32
    %c0_i32_1 = arith.constant 0 : i32
    return %c0_i32, %c0_i32_0 : i32, i32
  }
}

</mosaic_0001>

<bundles_post_ra>
// kernel: box_embed_forward.1
= control target key start
LH: loop header
LB: loop body
LE: loop exit
PB: predicated region body
PF: predicated region fallthrough
CT: control target
= control target key end

     0   :  { %s3320_s0 = inlined_call_operand.vmem [shape: bf16[128,512], index: 0, kind: input, shape index: {}]   ;;  %s3321_s1 = inlined_call_operand.vmem [shape: bf16[512,64], index: 1, kind: input, shape index: {}]   ;;  %s3322_s2 = inlined_call_operand.vmem [shape: f32[1,64], index: 2, kind: input, shape index: {}]   ;;  %s3323_s3 = inlined_call_operand.vmem [shape: bf16[64,32], index: 3, kind: input, shape index: {}]   ;;  %s3324_s4 = inlined_call_operand.vmem [shape: f32[1,32], index: 4, kind: input, shape index: {}]   ;;  %s3325_s5 = inlined_call_operand.vmem [shape: bf16[32,32], index: 5, kind: input, shape index: {}]   ;;  %s3326_s6 = inlined_call_operand.vmem [shape: f32[1,32], index: 6, kind: input, shape index: {}]   ;;  %s3327_s7 = inlined_call_operand.vmem [shape: bf16[16,32,25], index: 7, kind: input, shape index: {}]   ;;  %s3328_s8 = inlined_call_operand.vmem [shape: f32[1,25], index: 8, kind: input, shape index: {}]   ;;  %s3329_s9 = inlined_call_operand.hbm [shape: f32[8,25], index: 9, kind: output, shape index: {}]  }
   0x1   :  { %v2645_v0 = vld [vmem:[%s3321_s1 + $0x40] sm:$0xff]   ;;  %v2649_v4 = vld [vmem:[%s3321_s1 + $0x48] sm:$0xff]   ;;  %v2653_v8 = vld [vmem:[%s3321_s1 + $0x50] sm:$0xff]  }
   0x2   :  { %v2646_v1 = vld [vmem:[%s3321_s1 + $0xc0] sm:$0xff]   ;;  %2272 = vmatprep.subr.bf16.mxu0 %v2645_v0  ;;  %v2650_v5 = vld [vmem:[%s3321_s1 + $0xc8] sm:$0xff]   ;;  %v2654_v9 = vld [vmem:[%s3321_s1 + $0xd0] sm:$0xff]  }
   0x3   :  { %v2647_v2 = vld [vmem:[%s3321_s1] sm:$0xff]   ;;  %2336 = vmatprep.subr.bf16.mxu1 %v2646_v1  ;;  %v2651_v6 = vld [vmem:[%s3321_s1 + $0x8] sm:$0xff]   ;;  %v2655_v10 = vld [vmem:[%s3321_s1 + $0x10] sm:$0xff]  }
   0x4   :  { %v2648_v3 = vld [vmem:[%s3321_s1 + $0x80] sm:$0xff]   ;;  %2273 = vmatpush3.bf16.msra.mxu0 %v2647_v2  ;;  %v2652_v7 = vld [vmem:[%s3321_s1 + $0x88] sm:$0xff]   ;;  %v2656_v11 = vld [vmem:[%s3321_s1 + $0x90] sm:$0xff]  }
   0x5   :  { %2337 = vmatpush3.bf16.msra.mxu1 %v2648_v3  ;;  %2274 = vmatprep.subr.bf16.mxu0 %v2649_v4  ;;  %v2657_v12 = vld [vmem:[%s3321_s1 + $0x58] sm:$0xff]   ;;  %v2661_v16 = vld [vmem:[%s3321_s1 + $0x60] sm:$0xff]   ;;  %v2665_v20 = vld [vmem:[%s3321_s1 + $0x68] sm:$0xff]  }
   0x6   :  { %2338 = vmatprep.subr.bf16.mxu1 %v2650_v5  ;;  %v2658_v13 = vld [vmem:[%s3321_s1 + $0xd8] sm:$0xff]   ;;  %v2662_v17 = vld [vmem:[%s3321_s1 + $0xe0] sm:$0xff]   ;;  %v2666_v21 = vld [vmem:[%s3321_s1 + $0xe8] sm:$0xff]  }
   0x7   :  { %v2659_v14 = vld [vmem:[%s3321_s1 + $0x18] sm:$0xff]   ;;  %v2663_v18 = vld [vmem:[%s3321_s1 + $0x20] sm:$0xff]   ;;  %v2667_v22 = vld [vmem:[%s3321_s1 + $0x28] sm:$0xff]  }
   0x8   :  { %2275 = vmatpush3.bf16.msra.mxu0 %v2651_v6  ;;  %v2660_v15 = vld [vmem:[%s3321_s1 + $0x98] sm:$0xff]   ;;  %v2664_v19 = vld [vmem:[%s3321_s1 + $0xa0] sm:$0xff]   ;;  %v2668_v23 = vld [vmem:[%s3321_s1 + $0xa8] sm:$0xff]  }
   0x9   :  { %2339 = vmatpush3.bf16.msra.mxu1 %v2652_v7  ;;  %2276 = vmatprep.subr.bf16.mxu0 %v2653_v8  ;;  %v2669_v24 = vld [vmem:[%s3321_s1 + $0x70] sm:$0xff]   ;;  %v2673_v28 = vld [vmem:[%s3321_s1 + $0x78] sm:$0xff]   ;;  %v2725_v47 = vld [vmem:[%s3323_s3] sm:$0xff]  }
   0xa   :  { %2340 = vmatprep.subr.bf16.mxu1 %v2654_v9  ;;  %v2670_v25 = vld [vmem:[%s3321_s1 + $0xf0] sm:$0xff]   ;;  %v2674_v29 = vld [vmem:[%s3321_s1 + $0xf8] sm:$0xff]   ;;  %v2726_v50 = vld [vmem:[%s3323_s3 + $0x8] sm:$0xff]  }
   0xb   :  { %v2671_v26 = vld [vmem:[%s3321_s1 + $0x30] sm:$0xff]   ;;  %v2675_v30 = vld [vmem:[%s3321_s1 + $0x38] sm:$0xff]  }
   0xc   :  { %2277 = vmatpush3.bf16.msra.mxu0 %v2655_v10  ;;  %v2672_v27 = vld [vmem:[%s3321_s1 + $0xb0] sm:$0xff]   ;;  %v2676_v31 = vld [vmem:[%s3321_s1 + $0xb8] sm:$0xff]  }
   0xd   :  { %2341 = vmatpush3.bf16.msra.mxu1 %v2656_v11  ;;  %2278 = vmatprep.subr.bf16.mxu0 %v2657_v12  ;;  %v2677_v32 = vld [vmem:[%s3320_s0] ss:$16 sps:$4 sm:$0xff]   ;;  %v2679_v33 = vld [vmem:[%s3320_s0 + $0x4] ss:$16 sps:$4 sm:$0xff]   ;;  %v2680_v34 = vld [vmem:[%s3320_s0 + $0x8] ss:$16 sps:$4 sm:$0xff]  }
   0xe   :  { %2342 = vmatprep.subr.bf16.mxu1 %v2658_v13  ;;  %v2682_v35 = vld [vmem:[%s3320_s0 + $0xc] ss:$16 sps:$4 sm:$0xff]   ;;  %521 = vmatprep.mubr.bf16.mxu0 %v2679_v33  ;;  %v2683_v36 = vld [vmem:[%s3320_s0 + $0x24] ss:$16 sps:$4 sm:$0xff]   ;;  %v2687_v38 = vld [vmem:[%s3320_s0 + $0x20] ss:$16 sps:$4 sm:$0xff]  }
   0xf   :  { %618 = vmatprep.mubr.bf16.mxu1 %v2682_v35  ;;  %v2685_v37 = vld [vmem:[%s3320_s0 + $0x2c] ss:$16 sps:$4 sm:$0xff]   ;;  %v2688_v39 = vld [vmem:[%s3320_s0 + $0x28] ss:$16 sps:$4 sm:$0xff]   ;;  %v2689_v40 = vld [vmem:[%s3320_s0 + $0x44] ss:$16 sps:$4 sm:$0xff]  }
  0x10   :  { %2279 = vmatpush3.bf16.msra.mxu0 %v2659_v14  ;;  %v2692_v41 = vld [vmem:[%s3320_s0 + $0x4c] ss:$16 sps:$4 sm:$0xff]   ;;  %v2691_v42 = vld [vmem:[%s3320_s0 + $0x40] ss:$16 sps:$4 sm:$0xff]   ;;  %v2694_v43 = vld [vmem:[%s3320_s0 + $0x48] ss:$16 sps:$4 sm:$0xff]  }
  0x11   :  { %2343 = vmatpush3.bf16.msra.mxu1 %v2660_v15  ;;  %2280 = vmatprep.subr.bf16.mxu0 %v2661_v16  ;;  %v2695_v44 = vld [vmem:[%s3320_s0 + $0x64] ss:$16 sps:$4 sm:$0xff]   ;;  %v2698_v45 = vld [vmem:[%s3320_s0 + $0x6c] ss:$16 sps:$4 sm:$0xff]   ;;  %v2697_v46 = vld [vmem:[%s3320_s0 + $0x60] ss:$16 sps:$4 sm:$0xff]  }
  0x12   :  { %2344 = vmatprep.subr.bf16.mxu1 %v2662_v17  ;;  %v2700_v48 = vld [vmem:[%s3320_s0 + $0x68] ss:$16 sps:$4 sm:$0xff]   ;;  %v2701_v49 = vld [vmem:[%s3320_s0 + $0x84] ss:$16 sps:$4 sm:$0xff]   ;;  %v2704_v51 = vld [vmem:[%s3320_s0 + $0x8c] ss:$16 sps:$4 sm:$0xff]  }
  0x13   :  { %v2727_v52 = vld [vmem:[%s3323_s3 + $0x10] sm:$0xff]   ;;  %v2706_v54 = vld [vmem:[%s3320_s0 + $0x88] ss:$16 sps:$4 sm:$0xff]   ;;  %v2710_v56 = vld [vmem:[%s3320_s0 + $0xac] ss:$16 sps:$4 sm:$0xff]  }
  0x14   :  { %2281 = vmatpush3.bf16.msra.mxu0 %v2663_v18  ;;  %v2703_v53 = vld [vmem:[%s3320_s0 + $0x80] ss:$16 sps:$4 sm:$0xff]   ;;  %v2707_v55 = vld [vmem:[%s3320_s0 + $0xa4] ss:$16 sps:$4 sm:$0xff]   ;;  %v2712_v58 = vld [vmem:[%s3320_s0 + $0xa8] ss:$16 sps:$4 sm:$0xff]  }
  0x15   :  { %2345 = vmatpush3.bf16.msra.mxu1 %v2664_v19  ;;  %2282 = vmatprep.subr.bf16.mxu0 %v2665_v20  ;;  %v2709_v57 = vld [vmem:[%s3320_s0 + $0xa0] ss:$16 sps:$4 sm:$0xff]   ;;  %v2713_v59 = vld [vmem:[%s3320_s0 + $0xc4] ss:$16 sps:$4 sm:$0xff]   ;;  %v2716_v60 = vld [vmem:[%s3320_s0 + $0xcc] ss:$16 sps:$4 sm:$0xff]  }
  0x16   :  { %2346 = vmatprep.subr.bf16.mxu1 %v2666_v21 }
  0x18   :  { %2283 = vmatpush3.bf16.msra.mxu0 %v2667_v22 }
  0x19   :  { %2347 = vmatpush3.bf16.msra.mxu1 %v2668_v23  ;;  %2284 = vmatprep.subr.bf16.mxu0 %v2669_v24 }
  0x1a   :  { %2348 = vmatprep.subr.bf16.mxu1 %v2670_v25 }
  0x1c   :  { %2285 = vmatpush3.bf16.msra.mxu0 %v2671_v26 }
  0x1d   :  { %2349 = vmatpush3.bf16.msra.mxu1 %v2672_v27  ;;  %2286 = vmatprep.subr.bf16.mxu0 %v2673_v28 }
  0x1e   :  { %2350 = vmatprep.subr.bf16.mxu1 %v2674_v29 }
  0x20   :  { %2287 = vmatpush3.bf16.msra.mxu0 %v2675_v30 }
  0x21   :  { %2351 = vmatpush3.bf16.msra.mxu1 %v2676_v31  ;;  %2470 = vmatprep.subr.bf16.mxu0 %v2725_v47 }
  0x23   :  { %522 = vmatmul.mubr.bf16.vlgmr.msra.gmra.mrb[0].mxu0 %v2677_v32 }
  0x24   :  { %619 = vmatmul.mubr.bf16.vlgmr.msra.gmra.mrb[0].mxu1 %v2680_v34  ;;  %529 = vmatprep.mubr.bf16.mxu0 %v2683_v36 }
  0x25   :  { %626 = vmatprep.mubr.bf16.mxu1 %v2685_v37  ;;  %2471 = vmatpush3.bf16.msra.mxu0 %v2725_v47 }
  0x26   :  { %2472 = vmatprep.subr.bf16.mxu0 %v2726_v50 }
  0x29   :  { %2473 = vmatpush3.bf16.msra.mxu0 %v2726_v50 }
  0x2a   :  { %2474 = vmatprep.subr.bf16.mxu0 %v2727_v52 }
  0x2b   :  { %530 = vmatmul.mubr.bf16.gmra.mrb[4].mxu0 %v2687_v38 }
  0x2c   :  { %627 = vmatmul.mubr.bf16.gmra.mrb[4].mxu1 %v2688_v39  ;;  %537 = vmatprep.mubr.bf16.mxu0 %v2689_v40 }
  0x2d   :  { %634 = vmatprep.mubr.bf16.mxu1 %v2692_v41  ;;  %2475 = vmatpush3.bf16.msra.mxu0 %v2727_v52 }
  0x33   :  { %538 = vmatmul.mubr.bf16.gmra.mrb[8].mxu0 %v2691_v42 }
  0x34   :  { %635 = vmatmul.mubr.bf16.gmra.mrb[8].mxu1 %v2694_v43  ;;  %545 = vmatprep.mubr.bf16.mxu0 %v2695_v44 }
  0x35   :  { %642 = vmatprep.mubr.bf16.mxu1 %v2698_v45 }
  0x3b   :  { %546 = vmatmul.mubr.bf16.gmra.mrb[12].mxu0 %v2697_v46 }
  0x3c   :  { %643 = vmatmul.mubr.bf16.gmra.mrb[12].mxu1 %v2700_v48  ;;  %553 = vmatprep.mubr.bf16.mxu0 %v2701_v49 }
  0x3d   :  { %650 = vmatprep.mubr.bf16.mxu1 %v2704_v51 }
  0x43   :  { %554 = vmatmul.mubr.bf16.gmra.mrb[16].mxu0 %v2703_v53 }
  0x44   :  { %651 = vmatmul.mubr.bf16.gmra.mrb[16].mxu1 %v2706_v54  ;;  %561 = vmatprep.mubr.bf16.mxu0 %v2707_v55 }
  0x45   :  { %658 = vmatprep.mubr.bf16.mxu1 %v2710_v56 }
  0x4b   :  { %562 = vmatmul.mubr.bf16.gmra.mrb[20].mxu0 %v2709_v57 }
  0x4c   :  { %659 = vmatmul.mubr.bf16.gmra.mrb[20].mxu1 %v2712_v58  ;;  %569 = vmatprep.mubr.bf16.mxu0 %v2713_v59 }
  0x4d   :  { %666 = vmatprep.mubr.bf16.mxu1 %v2716_v60 }
  0x4e   :  { %14 = vsyncpa [#allocation3], 0  ;;  %v2715_v61 = vld [vmem:[%s3320_s0 + $0xc0] ss:$16 sps:$4 sm:$0xff]   ;;  %v2718_v62 = vld [vmem:[%s3320_s0 + $0xc8] ss:$16 sps:$4 sm:$0xff]  }
  0x4f   :  { %v2719_v63 = vld [vmem:[%s3320_s0 + $0xe4] ss:$16 sps:$4 sm:$0xff]   ;;  %v2722_v0 = vld [vmem:[%s3320_s0 + $0xec] ss:$16 sps:$4 sm:$0xff]   ;;  %v2721_v1 = vld [vmem:[%s3320_s0 + $0xe0] ss:$16 sps:$4 sm:$0xff]  }
  0x50   :  { %v2724_v2 = vld [vmem:[%s3320_s0 + $0xe8] ss:$16 sps:$4 sm:$0xff]   ;;  %v2729_v4 = vld [vmem:[%s3325_s5] sm:$0xff]   ;;  %vm746_vm0 = vcmask 523264   ;;  %vm915_vm1 = vcmask 261120   ;;  %vm2788_vm2 = vmmov 0  }
  0x51   :  { %v2728_v3 = vld [vmem:[%s3323_s3 + $0x18] sm:$0xff]   ;;  %v2730_v5 = vld [vmem:[%s3325_s5 + $0x8] sm:$0xff]   ;;  %2494 = vmatprep.subr.bf16.mxu1 %v2729_v4  ;;  %v3053_v8 = vld [vmem:[%s3322_s2] ss:$0 sm:$0xff]  ;;  %vm2058_vm3 = vcmask 203776  }
  0x52   :  { %2476 = vmatprep.subr.bf16.mxu0 %v2728_v3  ;;  %2495 = vmatpush3.bf16.msra.mxu1 %v2729_v4 }
  0x53   :  { %570 = vmatmul.mubr.bf16.gmra.mrb[24].mxu0 %v2715_v61  ;;  %2496 = vmatprep.subr.bf16.mxu1 %v2730_v5 }
  0x54   :  { %667 = vmatmul.mubr.bf16.gmra.mrb[24].mxu1 %v2718_v62  ;;  %577 = vmatprep.mubr.bf16.mxu0 %v2719_v63 }
  0x55   :  { %674 = vmatprep.mubr.bf16.mxu1 %v2722_v0  ;;  %2477 = vmatpush3.bf16.msra.mxu0 %v2728_v3 }
  0x56   :  { %2497 = vmatpush3.bf16.msra.mxu1 %v2730_v5 }
  0x5b   :  { %578 = vmatmul.mubr.bf16.gmra.mrb[28].mxu0 %v2721_v1 }
  0x5c   :  { %675 = vmatmul.mubr.bf16.gmra.mrb[28].mxu1 %v2724_v2 }
  0xf6   :  { %v2288_v6 = vpop.f32.mrb[0].mxu0 }
  0xf7   :  { %v2352_v7 = vpop.f32.mrb[0].mxu1  ;;  %v2289_v9 = vpop.f32.mrb[1].mxu0 }
  0xf8   :  { %v2290_v10 = vadd.f32 %v2289_v9, %v2288_v6  ;;  %v2353_v11 = vpop.f32.mrb[1].mxu1  ;;  %v2291_v12 = vpop.f32.mrb[2].mxu0 }
  0xf9   :  { %v2354_v13 = vadd.f32 %v2353_v11, %v2352_v7  ;;  %v2355_v14 = vpop.f32.mrb[2].mxu1  ;;  %v2292_v15 = vpop.f32.mrb[3].mxu0 }
  0xfa   :  { %v524_v16 = vadd.f32 %v2290_v10, %v3053_v8  ;;  %v2293_v17 = vadd.f32 %v2292_v15, %v2291_v12  ;;  %v2356_v18 = vpop.f32.mrb[3].mxu1 }
  0xfb   :  { %v2357_v19 = vadd.f32 %v2356_v18, %v2355_v14 }
  0xfc   :  { %v621_v20 = vadd.f32 %v2354_v13, %v524_v16  ;;  %v527_v21 = vadd.f32 %v2293_v17, %v3053_v8 }
  0xfe   :  { %v624_v22 = vadd.f32 %v2357_v19, %v527_v21  ;;  %v2294_v23 = vpop.f32.mrb[4].mxu0  ;;  %v683_v26 = vmax.f32 %v621_v20, 0.0 }
  0xff   :  { %v2358_v24 = vpop.f32.mrb[4].mxu1  ;;  %v2295_v25 = vpop.f32.mrb[5].mxu0 }
 0x100   :  { %v684_v27 = vmax.f32 %v624_v22, 0.0  ;;  %v2296_v28 = vadd.f32 %v2295_v25, %v2294_v23  ;;  %v2359_v29 = vpop.f32.mrb[5].mxu1  ;;  %v2297_v30 = vpop.f32.mrb[6].mxu0 }
 0x101   :  { %v2360_v31 = vadd.f32 %v2359_v29, %v2358_v24  ;;  %v2361_v32 = vpop.f32.mrb[6].mxu1  ;;  %v2298_v33 = vpop.f32.mrb[7].mxu0 }
 0x102   :  { %v699_v34 = vpack.c.bf16 %v684_v27, %v683_v26  ;;  %v532_v35 = vadd.f32 %v2296_v28, %v3053_v8  ;;  %v2299_v36 = vadd.f32 %v2298_v33, %v2297_v30  ;;  %v2362_v37 = vpop.f32.mrb[7].mxu1 }
 0x103   :  { %v2363_v38 = vadd.f32 %v2362_v37, %v2361_v32 }
 0x104   :  { %v629_v39 = vadd.f32 %v2360_v31, %v532_v35  ;;  %v535_v40 = vadd.f32 %v2299_v36, %v3053_v8  ;;  %2478 = vmatprep.mubr.msk.bf16.mxu0 %vm746_vm0, %v699_v34 }
 0x106   :  { %v632_v41 = vadd.f32 %v2363_v38, %v535_v40  ;;  %v2300_v42 = vpop.f32.mrb[8].mxu0  ;;  %v685_v45 = vmax.f32 %v629_v39, 0.0 }
 0x107   :  { %v2301_v43 = vpop.f32.mrb[9].mxu0  ;;  %v2364_v44 = vpop.f32.mrb[8].mxu1 }
 0x108   :  { %v686_v46 = vmax.f32 %v632_v41, 0.0  ;;  %v2302_v47 = vadd.f32 %v2301_v43, %v2300_v42  ;;  %v2303_v48 = vpop.f32.mrb[10].mxu0  ;;  %v2365_v49 = vpop.f32.mrb[9].mxu1 }
 0x109   :  { %v2366_v50 = vadd.f32 %v2365_v49, %v2364_v44  ;;  %v2304_v51 = vpop.f32.mrb[11].mxu0  ;;  %v2367_v52 = vpop.f32.mrb[10].mxu1 }
 0x10a   :  { %v700_v53 = vpack.c.bf16 %v686_v46, %v685_v45  ;;  %v540_v54 = vadd.f32 %v2302_v47, %v3053_v8  ;;  %v2305_v55 = vadd.f32 %v2304_v51, %v2303_v48  ;;  %v2368_v56 = vpop.f32.mrb[11].mxu1 }
 0x10b   :  { %v2369_v57 = vadd.f32 %v2368_v56, %v2367_v52 }
 0x10c   :  { %v637_v58 = vadd.f32 %v2366_v50, %v540_v54  ;;  %v543_v59 = vadd.f32 %v2305_v55, %v3053_v8  ;;  %2479 = vmatmul.mubr.msk.bf16.vlgmr.msra.gmra.mrb[32].mxu0 %vm746_vm0, %v700_v53 }
 0x10e   :  { %v687_v60 = vmax.f32 %v637_v58, 0.0  ;;  %v640_v61 = vadd.f32 %v2369_v57, %v543_v59  ;;  %v2306_v62 = vpop.f32.mrb[12].mxu0 }
 0x10f   :  { %v2307_v63 = vpop.f32.mrb[13].mxu0  ;;  %v2370_v0 = vpop.f32.mrb[12].mxu1 }
 0x110   :  { %v688_v1 = vmax.f32 %v640_v61, 0.0  ;;  %v2308_v2 = vadd.f32 %v2307_v63, %v2306_v62  ;;  %v2309_v3 = vpop.f32.mrb[14].mxu0  ;;  %v2371_v4 = vpop.f32.mrb[13].mxu1 }
 0x111   :  { %v2372_v5 = vadd.f32 %v2371_v4, %v2370_v0  ;;  %v2310_v6 = vpop.f32.mrb[15].mxu0  ;;  %v2373_v7 = vpop.f32.mrb[14].mxu1 }
 0x112   :  { %v701_v9 = vpack.c.bf16 %v688_v1, %v687_v60  ;;  %v548_v10 = vadd.f32 %v2308_v2, %v3053_v8  ;;  %v2311_v11 = vadd.f32 %v2310_v6, %v2309_v3  ;;  %v2374_v12 = vpop.f32.mrb[15].mxu1 }
 0x113   :  { %v2375_v13 = vadd.f32 %v2374_v12, %v2373_v7 }
 0x114   :  { %v645_v14 = vadd.f32 %v2372_v5, %v548_v10  ;;  %v551_v15 = vadd.f32 %v2311_v11, %v3053_v8  ;;  %2482 = vmatprep.mubr.msk.bf16.mxu0 %vm746_vm0, %v701_v9 }
 0x116   :  { %v689_v16 = vmax.f32 %v645_v14, 0.0  ;;  %v648_v17 = vadd.f32 %v2375_v13, %v551_v15  ;;  %v2312_v18 = vpop.f32.mrb[16].mxu0 }
 0x117   :  { %v2313_v19 = vpop.f32.mrb[17].mxu0  ;;  %v2376_v20 = vpop.f32.mrb[16].mxu1 }
 0x118   :  { %v690_v21 = vmax.f32 %v648_v17, 0.0  ;;  %v2314_v22 = vadd.f32 %v2313_v19, %v2312_v18  ;;  %v2315_v23 = vpop.f32.mrb[18].mxu0  ;;  %v2377_v24 = vpop.f32.mrb[17].mxu1 }
 0x119   :  { %v2378_v25 = vadd.f32 %v2377_v24, %v2376_v20  ;;  %v2316_v26 = vpop.f32.mrb[19].mxu0  ;;  %v2379_v27 = vpop.f32.mrb[18].mxu1 }
 0x11a   :  { %v702_v28 = vpack.c.bf16 %v690_v21, %v689_v16  ;;  %v556_v29 = vadd.f32 %v2314_v22, %v3053_v8  ;;  %v2317_v30 = vadd.f32 %v2316_v26, %v2315_v23  ;;  %v2380_v31 = vpop.f32.mrb[19].mxu1 }
 0x11b   :  { %v2381_v32 = vadd.f32 %v2380_v31, %v2379_v27 }
 0x11c   :  { %v653_v33 = vadd.f32 %v2378_v25, %v556_v29  ;;  %v559_v34 = vadd.f32 %v2317_v30, %v3053_v8  ;;  %2483 = vmatmul.mubr.msk.bf16.gmra.mrb[36].mxu0 %vm746_vm0, %v702_v28 }
 0x11e   :  { %v691_v35 = vmax.f32 %v653_v33, 0.0  ;;  %v656_v36 = vadd.f32 %v2381_v32, %v559_v34  ;;  %v2318_v37 = vpop.f32.mrb[20].mxu0  ;;  %v2731_v33 = vld [vmem:[%s3327_s7 + $0x10] sm:$0xff]   ;;  %v2787_v34 = vmov 0.0  }
 0x11f   :  { %v2319_v38 = vpop.f32.mrb[21].mxu0  ;;  %v2382_v39 = vpop.f32.mrb[20].mxu1  ;;  %2514 = vmatprep.subr.bf16.mxu0 %v2787_v34  ;;  %2522 = vmatprep.subr.bf16.mxu1 %v2787_v34 }
 0x120   :  { %v692_v40 = vmax.f32 %v656_v36, 0.0  ;;  %v2320_v41 = vadd.f32 %v2319_v38, %v2318_v37  ;;  %v2321_v42 = vpop.f32.mrb[22].mxu0  ;;  %v2383_v43 = vpop.f32.mrb[21].mxu1  ;;  %2515 = vmatpush3.bf16.msra.mxu0 %v2731_v33 }
 0x121   :  { %v2384_v44 = vadd.f32 %v2383_v43, %v2382_v39  ;;  %v2322_v45 = vpop.f32.mrb[23].mxu0  ;;  %v2385_v46 = vpop.f32.mrb[22].mxu1  ;;  %2516 = vmatprep.subr.bf16.mxu0 %v2787_v34 }
 0x122   :  { %v703_v47 = vpack.c.bf16 %v692_v40, %v691_v35  ;;  %v564_v48 = vadd.f32 %v2320_v41, %v3053_v8  ;;  %v2323_v49 = vadd.f32 %v2322_v45, %v2321_v42  ;;  %v2386_v50 = vpop.f32.mrb[23].mxu1  ;;  %v3092_v35 = vld [vmem:[%s3324_s4] ss:$0 sm:$0xff] }
 0x123   :  { %v2387_v51 = vadd.f32 %v2386_v50, %v2385_v46  ;;  %v2732_v50 = vld [vmem:[%s3327_s7] sm:$0xff]  }
 0x124   :  { %v661_v52 = vadd.f32 %v2384_v44, %v564_v48  ;;  %v567_v53 = vadd.f32 %v2323_v49, %v3053_v8  ;;  %2486 = vmatprep.mubr.msk.bf16.mxu0 %vm746_vm0, %v703_v47 }
 0x126   :  { %v693_v54 = vmax.f32 %v661_v52, 0.0  ;;  %v664_v55 = vadd.f32 %v2387_v51, %v567_v53  ;;  %v2324_v56 = vpop.f32.mrb[24].mxu0  ;;  %v2734_v51 = vld [vmem:[%s3327_s7 + $0x8] sm:$0xff]  }
 0x127   :  { %v2325_v57 = vpop.f32.mrb[25].mxu0  ;;  %v2388_v58 = vpop.f32.mrb[24].mxu1 }
 0x128   :  { %v694_v59 = vmax.f32 %v664_v55, 0.0  ;;  %v2326_v60 = vadd.f32 %v2325_v57, %v2324_v56  ;;  %v2327_v61 = vpop.f32.mrb[26].mxu0  ;;  %v2389_v62 = vpop.f32.mrb[25].mxu1 }
 0x129   :  { %v2390_v63 = vadd.f32 %v2389_v62, %v2388_v58  ;;  %v2328_v0 = vpop.f32.mrb[27].mxu0  ;;  %v2391_v1 = vpop.f32.mrb[26].mxu1 }
 0x12a   :  { %v704_v2 = vpack.c.bf16 %v694_v59, %v693_v54  ;;  %v572_v3 = vadd.f32 %v2326_v60, %v3053_v8  ;;  %v2329_v4 = vadd.f32 %v2328_v0, %v2327_v61  ;;  %v2392_v5 = vpop.f32.mrb[27].mxu1 }
 0x12b   :  { %v2393_v6 = vadd.f32 %v2392_v5, %v2391_v1 }
 0x12c   :  { %v669_v7 = vadd.f32 %v2390_v63, %v572_v3  ;;  %v575_v9 = vadd.f32 %v2329_v4, %v3053_v8  ;;  %2487 = vmatmul.mubr.msk.bf16.gmra.mrb[40].mxu0 %vm746_vm0, %v704_v2 }
 0x12e   :  { %v695_v10 = vmax.f32 %v669_v7, 0.0  ;;  %v672_v11 = vadd.f32 %v2393_v6, %v575_v9  ;;  %v2330_v12 = vpop.f32.mrb[28].mxu0 }
 0x12f   :  { %v2331_v13 = vpop.f32.mrb[29].mxu0  ;;  %v2394_v14 = vpop.f32.mrb[28].mxu1 }
 0x130   :  { %v696_v15 = vmax.f32 %v672_v11, 0.0  ;;  %v2332_v16 = vadd.f32 %v2331_v13, %v2330_v12  ;;  %v2333_v17 = vpop.f32.mrb[30].mxu0  ;;  %v2395_v18 = vpop.f32.mrb[29].mxu1 }
 0x131   :  { %v2396_v19 = vadd.f32 %v2395_v18, %v2394_v14  ;;  %v2334_v20 = vpop.f32.mrb[31].mxu0  ;;  %v2397_v21 = vpop.f32.mrb[30].mxu1 }
 0x132   :  { %v705_v22 = vpack.c.bf16 %v696_v15, %v695_v10  ;;  %v580_v23 = vadd.f32 %v2332_v16, %v3053_v8  ;;  %v2335_v24 = vadd.f32 %v2334_v20, %v2333_v17  ;;  %v2398_v25 = vpop.f32.mrb[31].mxu1 }
 0x133   :  { %v2399_v26 = vadd.f32 %v2398_v25, %v2397_v21 }
 0x134   :  { %v677_v27 = vadd.f32 %v2396_v19, %v580_v23  ;;  %v583_v28 = vadd.f32 %v2335_v24, %v3053_v8  ;;  %2490 = vmatprep.mubr.msk.bf16.mxu0 %vm746_vm0, %v705_v22  ;;  %v2733_v8 = vld [vmem:[%s3327_s7 + $0x18] sm:$0xff]  }
 0x135   :  { %2517 = vmatpush3.bf16.msra.mxu0 %v2733_v8 }
 0x136   :  { %v697_v29 = vmax.f32 %v677_v27, 0.0  ;;  %v680_v30 = vadd.f32 %v2399_v26, %v583_v28  ;;  %2530 = vmatprep.subr.bf16.mxu0 %v2787_v34 }
 0x138   :  { %v698_v31 = vmax.f32 %v680_v30, 0.0 }
 0x13a   :  { %v706_v32 = vpack.c.bf16 %v698_v31, %v697_v29  ;;  %v3133_v31 = vld [vmem:[%s3326_s6] ss:$0 sm:$0xff]  ;;  %s2789_s6 = smov [#allocation2]  }
 0x13b   :  { %s2066_s29 = sshll.u32 %s2789_s6, 4  ;;  %s2067_s29 = int_to_ptr.vmem [resolvable:$true] %s2066_s29 }
 0x13c   :  { %2491 = vmatmul.mubr.msk.bf16.gmra.mrb[44].mxu0 %vm746_vm0, %v706_v32  ;;  %s2763_s30 = scalar_lea.vmem %s2067_s29, 128  ;;  %p2768_p1 = scmp.lt.s32.totalorder %s2067_s29, %s2067_s29 }
 0x13d   :  { %2518 = vmatprep.mubr.msk.bf16.mxu0 %vm2788_vm2, %v2787_v34  ;;  %p2764_p0 = scmp.ne.s32.totalorder %s2067_s29, %s2763_s30  ;;  %p2769_p2 = scmp.lt.s32.totalorder %s2763_s30, %s2763_s30 }
 0x13f   :  { %p2770_p3 = por %p2769_p2, %p2768_p1 }
 0x141   :  { %p2771_p4 = pnand %p2770_p3, %p2764_p0 }
 0x1df   :  { %v2480_v36 = vpop.f32.mrb[32].mxu0 }
 0x1e0   :  { %v814_v37 = vadd.f32 %v2480_v36, %v3092_v35  ;;  %v805_v38 = vpop.f32.mrb[33].mxu0 }
 0x1e1   :  { %v806_v39 = vadd.f32 %v3092_v35, %v805_v38  ;;  %v2481_v40 = vpop.f32.mrb[34].mxu0 }
 0x1e2   :  { %v817_v41 = vadd.f32 %v2481_v40, %v3092_v35  ;;  %v808_v42 = vpop.f32.mrb[35].mxu0  ;;  %v870_v44 = vmax.f32 %v814_v37, 0.0 }
 0x1e3   :  { %v809_v43 = vadd.f32 %v3092_v35, %v808_v42  ;;  %v868_v46 = vmax.f32 %v806_v39, 0.0 }
 0x1e4   :  { %v871_v45 = vmax.f32 %v817_v41, 0.0 }
 0x1e5   :  { %v869_v47 = vmax.f32 %v809_v43, 0.0 }
 0x1e6   :  { %v885_v48 = vpack.c.bf16 %v871_v45, %v870_v44  ;;  %v2735_v45 = vld [vmem:[%s3327_s7 + $0x30] sm:$0xff]  }
 0x1e7   :  { %v884_v49 = vpack.c.bf16 %v869_v47, %v868_v46  ;;  %v2736_v47 = vld [vmem:[%s3327_s7 + $0x20] sm:$0xff]  }
 0x1e9   :  { %2498 = vmatprep.mubr.msk.bf16.mxu1 %vm915_vm1, %v884_v49  ;;  %v2737_v49 = vld [vmem:[%s3327_s7 + $0x38] sm:$0xff]  }
 0x1ea   :  { %2499 = vmatmul.mubr.msk.bf16.vlgmr.msra.gmra.mrb[32].mxu1 %vm915_vm1, %v885_v48 }
 0x1eb   :  { %2523 = vmatpush3.bf16.msra.mxu1 %v2732_v50  ;;  %v2738_v50 = vld [vmem:[%s3327_s7 + $0x28] sm:$0xff]  }
 0x1ec   :  { %2524 = vmatprep.subr.bf16.mxu1 %v2787_v34 }
 0x1ef   :  { %v2484_v52 = vpop.f32.mrb[36].mxu0  ;;  %2525 = vmatpush3.bf16.msra.mxu1 %v2734_v51  ;;  %v2740_v51 = vld [vmem:[%s3327_s7 + $0x50] sm:$0xff]  }
 0x1f0   :  { %v830_v53 = vadd.f32 %v2484_v52, %v3092_v35  ;;  %v821_v54 = vpop.f32.mrb[37].mxu0  ;;  %2538 = vmatprep.subr.bf16.mxu1 %v2787_v34 }
 0x1f1   :  { %v822_v55 = vadd.f32 %v3092_v35, %v821_v54  ;;  %v2485_v56 = vpop.f32.mrb[38].mxu0 }
 0x1f2   :  { %v833_v57 = vadd.f32 %v2485_v56, %v3092_v35  ;;  %v824_v58 = vpop.f32.mrb[39].mxu0  ;;  %v874_v60 = vmax.f32 %v830_v53, 0.0  ;;  %v2739_v56 = vld [vmem:[%s3327_s7 + $0x40] sm:$0xff]  }
 0x1f3   :  { %v825_v59 = vadd.f32 %v3092_v35, %v824_v58  ;;  %v872_v62 = vmax.f32 %v822_v55, 0.0 }
 0x1f4   :  { %v875_v61 = vmax.f32 %v833_v57, 0.0 }
 0x1f5   :  { %v873_v63 = vmax.f32 %v825_v59, 0.0 }
 0x1f6   :  { %v887_v0 = vpack.c.bf16 %v875_v61, %v874_v60  ;;  %v2742_v61 = vld [vmem:[%s3327_s7 + $0x58] sm:$0xff]  }
 0x1f7   :  { %v886_v1 = vpack.c.bf16 %v873_v63, %v872_v62 }
 0x1f9   :  { %2502 = vmatprep.mubr.msk.bf16.mxu1 %vm915_vm1, %v886_v1  ;;  %v2741_v1 = vld [vmem:[%s3327_s7 + $0x48] sm:$0xff]  }
 0x1fa   :  { %2503 = vmatmul.mubr.msk.bf16.gmra.mrb[36].mxu1 %vm915_vm1, %v887_v0 }
 0x1ff   :  { %v2488_v2 = vpop.f32.mrb[40].mxu0 }
 0x200   :  { %v846_v3 = vadd.f32 %v2488_v2, %v3092_v35  ;;  %v837_v4 = vpop.f32.mrb[41].mxu0 }
 0x201   :  { %v838_v5 = vadd.f32 %v3092_v35, %v837_v4  ;;  %v2489_v6 = vpop.f32.mrb[42].mxu0 }
 0x202   :  { %v849_v7 = vadd.f32 %v2489_v6, %v3092_v35  ;;  %v840_v9 = vpop.f32.mrb[43].mxu0  ;;  %v878_v11 = vmax.f32 %v846_v3, 0.0  ;;  %v2743_v6 = vld [vmem:[%s3327_s7 + $0x60] sm:$0xff]  }
 0x203   :  { %v841_v10 = vadd.f32 %v3092_v35, %v840_v9  ;;  %v876_v13 = vmax.f32 %v838_v5, 0.0 }
 0x204   :  { %v879_v12 = vmax.f32 %v849_v7, 0.0  ;;  %v2744_v7 = vld [vmem:[%s3327_s7 + $0x70] sm:$0xff]  }
 0x205   :  { %v877_v14 = vmax.f32 %v841_v10, 0.0  ;;  %v2745_v10 = vld [vmem:[%s3327_s7 + $0x68] sm:$0xff]  }
 0x206   :  { %v889_v15 = vpack.c.bf16 %v879_v12, %v878_v11  ;;  %v2746_v11 = vld [vmem:[%s3327_s7 + $0x78] sm:$0xff]  }
 0x207   :  { %v888_v16 = vpack.c.bf16 %v877_v14, %v876_v13 }
 0x209   :  { %2506 = vmatprep.mubr.msk.bf16.mxu1 %vm915_vm1, %v888_v16  ;;  %v2748_v16 = vld [vmem:[%s3327_s7 + $0x90] sm:$0xff]  }
 0x20a   :  { %2507 = vmatmul.mubr.msk.bf16.gmra.mrb[40].mxu1 %vm915_vm1, %v889_v15  ;;  %v2747_v15 = vld [vmem:[%s3327_s7 + $0x80] sm:$0xff]  }
 0x20f   :  { %v2492_v17 = vpop.f32.mrb[44].mxu0 }
 0x210   :  { %v862_v18 = vadd.f32 %v2492_v17, %v3092_v35  ;;  %v853_v19 = vpop.f32.mrb[45].mxu0 }
 0x211   :  { %v854_v20 = vadd.f32 %v3092_v35, %v853_v19  ;;  %v2493_v21 = vpop.f32.mrb[46].mxu0 }
 0x212   :  { %v865_v22 = vadd.f32 %v2493_v21, %v3092_v35  ;;  %v856_v23 = vpop.f32.mrb[47].mxu0  ;;  %v882_v25 = vmax.f32 %v862_v18, 0.0 }
 0x213   :  { %v857_v24 = vadd.f32 %v3092_v35, %v856_v23  ;;  %v880_v27 = vmax.f32 %v854_v20, 0.0 }
 0x214   :  { %v883_v26 = vmax.f32 %v865_v22, 0.0 }
 0x215   :  { %v881_v28 = vmax.f32 %v857_v24, 0.0 }
 0x216   :  { %v891_v29 = vpack.c.bf16 %v883_v26, %v882_v25  ;;  %v2749_v25 = vld [vmem:[%s3327_s7 + $0x88] sm:$0xff]   ;;  %v2750_v26 = vld [vmem:[%s3327_s7 + $0x98] sm:$0xff]  }
 0x217   :  { %v890_v30 = vpack.c.bf16 %v881_v28, %v880_v27 }
 0x219   :  { %2510 = vmatprep.mubr.msk.bf16.mxu1 %vm915_vm1, %v890_v30 }
 0x21a   :  { %2511 = vmatmul.mubr.msk.bf16.gmra.mrb[44].mxu1 %vm915_vm1, %v891_v29 }
 0x21b   :  { %2526 = vmatprep.mubr.msk.bf16.mxu1 %vm2788_vm2, %v2787_v34 }
 0x2bd   :  { %v2500_v32 = vpop.f32.mrb[32].mxu1 }
 0x2be   :  { %v983_v33 = vadd.f32 %v2500_v32, %v3133_v31  ;;  %v974_v8 = vpop.f32.mrb[33].mxu1  ;;  %v2751_v32 = vld [vmem:[%s3327_s7 + $0xa0] sm:$0xff]  }
 0x2bf   :  { %v975_v35 = vadd.f32 %v3133_v31, %v974_v8  ;;  %v2501_v36 = vpop.f32.mrb[34].mxu1 }
 0x2c0   :  { %v986_v37 = vadd.f32 %v2501_v36, %v3133_v31  ;;  %v977_v38 = vpop.f32.mrb[35].mxu1  ;;  %v1039_v40 = vmax.f32 %v983_v33, 0.0  ;;  %v2752_v33 = vld [vmem:[%s3327_s7 + $0xb0] sm:$0xff]   ;;  %v2754_v36 = vld [vmem:[%s3327_s7 + $0xb8] sm:$0xff]  }
 0x2c1   :  { %v978_v39 = vadd.f32 %v3133_v31, %v977_v38  ;;  %v1037_v42 = vmax.f32 %v975_v35, 0.0  ;;  %v2753_v35 = vld [vmem:[%s3327_s7 + $0xa8] sm:$0xff]  }
 0x2c2   :  { %v1040_v41 = vmax.f32 %v986_v37, 0.0 }
 0x2c3   :  { %v1038_v43 = vmax.f32 %v978_v39, 0.0 }
 0x2c4   :  { %v1054_v44 = vpack.c.bf16 %v1040_v41, %v1039_v40  ;;  %v2755_v40 = vld [vmem:[%s3327_s7 + $0xc0] sm:$0xff]   ;;  %v2756_v41 = vld [vmem:[%s3327_s7 + $0xd0] sm:$0xff]  }
 0x2c5   :  { %v1053_v46 = vpack.c.bf16 %v1038_v43, %v1037_v42 }
 0x2c6   :  { %v1249_v52 = vrot.slane %v1054_v44, 4 }
 0x2c7   :  { %v1071_v48 = vrot.slane %v1053_v46, 4  ;;  %2527 = vmatmul.mubr.msk.bf16.vlgmr.msra.gmra.mrb[48].mxu1 %vm915_vm1, %v1053_v46 }
 0x2c8   :  { %2539 = vmatpush3.bf16.msra.mxu1 %v2735_v45  ;;  %2542 = vmatprep.mubr.msk.bf16.mxu1 %vm2788_vm2, %v2787_v34 }
 0x2c9   :  { %2519 = vmatmul.mubr.msk.bf16.vlgmr.msra.gmra.mrb[48].mxu0 %vm915_vm1, %v1071_v48  ;;  %2540 = vmatprep.subr.bf16.mxu1 %v2787_v34 }
 0x2ca   :  { %2531 = vmatpush3.bf16.msra.mxu0 %v2736_v47  ;;  %2534 = vmatprep.mubr.msk.bf16.mxu0 %vm2788_vm2, %v2787_v34 }
 0x2cb   :  { %2532 = vmatprep.subr.bf16.mxu0 %v2787_v34 }
 0x2cc   :  { %2541 = vmatpush3.bf16.msra.mxu1 %v2737_v49 }
 0x2cd   :  { %v2504_v53 = vpop.f32.mrb[36].mxu1  ;;  %2554 = vmatprep.subr.bf16.mxu1 %v2787_v34 }
 0x2ce   :  { %v999_v54 = vadd.f32 %v2504_v53, %v3133_v31  ;;  %2533 = vmatpush3.bf16.msra.mxu0 %v2738_v50  ;;  %v990_v55 = vpop.f32.mrb[37].mxu1  ;;  %v2757_v50 = vld [vmem:[%s3327_s7 + $0xc8] sm:$0xff]  }
 0x2cf   :  { %v991_v57 = vadd.f32 %v3133_v31, %v990_v55  ;;  %v2505_v58 = vpop.f32.mrb[38].mxu1  ;;  %2543 = vmatmul.mubr.msk.bf16.vlgmr.msra.gmra.mrb[52].mxu1 %vm915_vm1, %v1249_v52  ;;  %2546 = vmatprep.subr.bf16.mxu0 %v2787_v34  ;;  %v2759_v55 = vld [vmem:[%s3327_s7 + $0xe0] sm:$0xff]  }
 0x2d0   :  { %v1002_v59 = vadd.f32 %v2505_v58, %v3133_v31  ;;  %v993_v60 = vpop.f32.mrb[39].mxu1  ;;  %2555 = vmatpush3.bf16.msra.mxu1 %v2740_v51  ;;  %2558 = vmatprep.mubr.msk.bf16.mxu1 %vm2788_vm2, %v2787_v34  ;;  %v1043_v63 = vmax.f32 %v999_v54, 0.0  ;;  %v2758_v51 = vld [vmem:[%s3327_s7 + $0xd8] sm:$0xff]   ;;  %v2761_v58 = vld [vmem:[%s3327_s7 + $0xe8] sm:$0xff]  }
 0x2d1   :  { %v994_v62 = vadd.f32 %v3133_v31, %v993_v60  ;;  %2535 = vmatmul.mubr.msk.bf16.vlgmr.msra.gmra.mrb[52].mxu0 %vm915_vm1, %v1054_v44  ;;  %2556 = vmatprep.subr.bf16.mxu1 %v2787_v34  ;;  %v1041_v2 = vmax.f32 %v991_v57, 0.0 }
 0x2d2   :  { %v1044_v0 = vmax.f32 %v1002_v59, 0.0  ;;  %2547 = vmatpush3.bf16.msra.mxu0 %v2739_v56  ;;  %2550 = vmatprep.mubr.msk.bf16.mxu0 %vm2788_vm2, %v2787_v34  ;;  %v2760_v56 = vld [vmem:[%s3327_s7 + $0xf0] sm:$0xff]   ;;  %v2762_v59 = vld [vmem:[%s3327_s7 + $0xf8] sm:$0xff]  }
 0x2d3   :  { %v1042_v3 = vmax.f32 %v994_v62, 0.0  ;;  %2548 = vmatprep.subr.bf16.mxu0 %v2787_v34 }
 0x2d4   :  { %v1056_v4 = vpack.c.bf16 %v1044_v0, %v1043_v63  ;;  %2557 = vmatpush3.bf16.msra.mxu1 %v2742_v61 }
 0x2d5   :  { %v1055_v5 = vpack.c.bf16 %v1042_v3, %v1041_v2  ;;  %2570 = vmatprep.subr.bf16.mxu1 %v2787_v34 }
 0x2d6   :  { %2549 = vmatpush3.bf16.msra.mxu0 %v2741_v1  ;;  %v1497_v17 = vrot.slane %v1056_v4, 4 }
 0x2d7   :  { %v1373_v9 = vrot.slane %v1055_v5, 4  ;;  %2562 = vmatprep.subr.bf16.mxu0 %v2787_v34 }
 0x2d9   :  { %2551 = vmatmul.mubr.msk.bf16.vlgmr.msra.gmra.mrb[56].mxu0 %vm915_vm1, %v1055_v5  ;;  %2559 = vmatmul.mubr.msk.bf16.vlgmr.msra.gmra.mrb[56].mxu1 %vm915_vm1, %v1373_v9 }
 0x2da   :  { %2563 = vmatpush3.bf16.msra.mxu0 %v2743_v6  ;;  %2571 = vmatpush3.bf16.msra.mxu1 %v2744_v7 }
 0x2db   :  { %2564 = vmatprep.subr.bf16.mxu0 %v2787_v34  ;;  %2572 = vmatprep.subr.bf16.mxu1 %v2787_v34 }
 0x2dc   :  { %2566 = vmatprep.mubr.msk.bf16.mxu0 %vm2788_vm2, %v2787_v34  ;;  %2574 = vmatprep.mubr.msk.bf16.mxu1 %vm2788_vm2, %v2787_v34 }
 0x2dd   :  { %v2508_v12 = vpop.f32.mrb[40].mxu1 }
 0x2de   :  { %v1015_v13 = vadd.f32 %v2508_v12, %v3133_v31  ;;  %2565 = vmatpush3.bf16.msra.mxu0 %v2745_v10  ;;  %v1006_v14 = vpop.f32.mrb[41].mxu1  ;;  %2573 = vmatpush3.bf16.msra.mxu1 %v2746_v11 }
 0x2df   :  { %v1007_v18 = vadd.f32 %v3133_v31, %v1006_v14  ;;  %v2509_v19 = vpop.f32.mrb[42].mxu1  ;;  %2578 = vmatprep.subr.bf16.mxu0 %v2787_v34  ;;  %2586 = vmatprep.subr.bf16.mxu1 %v2787_v34 }
 0x2e0   :  { %v1018_v20 = vadd.f32 %v2509_v19, %v3133_v31  ;;  %v1009_v21 = vpop.f32.mrb[43].mxu1  ;;  %v1047_v23 = vmax.f32 %v1015_v13, 0.0 }
 0x2e1   :  { %v1010_v22 = vadd.f32 %v3133_v31, %v1009_v21  ;;  %2567 = vmatmul.mubr.msk.bf16.vlgmr.msra.gmra.mrb[60].mxu0 %vm915_vm1, %v1056_v4  ;;  %2575 = vmatmul.mubr.msk.bf16.vlgmr.msra.gmra.mrb[60].mxu1 %vm915_vm1, %v1497_v17  ;;  %v1045_v27 = vmax.f32 %v1007_v18, 0.0 }
 0x2e2   :  { %v1048_v24 = vmax.f32 %v1018_v20, 0.0  ;;  %2579 = vmatpush3.bf16.msra.mxu0 %v2747_v15  ;;  %2587 = vmatpush3.bf16.msra.mxu1 %v2748_v16 }
 0x2e3   :  { %v1046_v28 = vmax.f32 %v1010_v22, 0.0  ;;  %2580 = vmatprep.subr.bf16.mxu0 %v2787_v34  ;;  %2588 = vmatprep.subr.bf16.mxu1 %v2787_v34 }
 0x2e4   :  { %v1058_v29 = vpack.c.bf16 %v1048_v24, %v1047_v23  ;;  %2582 = vmatprep.mubr.msk.bf16.mxu0 %vm2788_vm2, %v2787_v34  ;;  %2590 = vmatprep.mubr.msk.bf16.mxu1 %vm2788_vm2, %v2787_v34 }
 0x2e5   :  { %v1057_v30 = vpack.c.bf16 %v1046_v28, %v1045_v27 }
 0x2e6   :  { %2581 = vmatpush3.bf16.msra.mxu0 %v2749_v25  ;;  %2589 = vmatpush3.bf16.msra.mxu1 %v2750_v26  ;;  %v1745_v42 = vrot.slane %v1058_v29, 4 }
 0x2e7   :  { %v1621_v8 = vrot.slane %v1057_v30, 4  ;;  %2594 = vmatprep.subr.bf16.mxu0 %v2787_v34  ;;  %2602 = vmatprep.subr.bf16.mxu1 %v2787_v34 }
 0x2e9   :  { %2583 = vmatmul.mubr.msk.bf16.vlgmr.msra.gmra.mrb[64].mxu0 %vm915_vm1, %v1057_v30  ;;  %2591 = vmatmul.mubr.msk.bf16.vlgmr.msra.gmra.mrb[64].mxu1 %vm915_vm1, %v1621_v8 }
 0x2ea   :  { %2595 = vmatpush3.bf16.msra.mxu0 %v2751_v32  ;;  %2603 = vmatpush3.bf16.msra.mxu1 %v2752_v33 }
 0x2eb   :  { %2596 = vmatprep.subr.bf16.mxu0 %v2787_v34  ;;  %2604 = vmatprep.subr.bf16.mxu1 %v2787_v34 }
 0x2ec   :  { %2598 = vmatprep.mubr.msk.bf16.mxu0 %vm2788_vm2, %v2787_v34  ;;  %2606 = vmatprep.mubr.msk.bf16.mxu1 %vm2788_vm2, %v2787_v34 }
 0x2ed   :  { %v2512_v37 = vpop.f32.mrb[44].mxu1 }
 0x2ee   :  { %v1031_v38 = vadd.f32 %v2512_v37, %v3133_v31  ;;  %2597 = vmatpush3.bf16.msra.mxu0 %v2753_v35  ;;  %v1022_v39 = vpop.f32.mrb[45].mxu1  ;;  %2605 = vmatpush3.bf16.msra.mxu1 %v2754_v36 }
 0x2ef   :  { %v1023_v43 = vadd.f32 %v3133_v31, %v1022_v39  ;;  %v2513_v44 = vpop.f32.mrb[46].mxu1  ;;  %2610 = vmatprep.subr.bf16.mxu0 %v2787_v34  ;;  %2618 = vmatprep.subr.bf16.mxu1 %v2787_v34 }
 0x2f0   :  { %v1034_v45 = vadd.f32 %v2513_v44, %v3133_v31  ;;  %v1025_v46 = vpop.f32.mrb[47].mxu1  ;;  %v1051_v48 = vmax.f32 %v1031_v38, 0.0 }
 0x2f1   :  { %v1026_v47 = vadd.f32 %v3133_v31, %v1025_v46  ;;  %2599 = vmatmul.mubr.msk.bf16.vlgmr.msra.gmra.mrb[68].mxu0 %vm915_vm1, %v1058_v29  ;;  %2607 = vmatmul.mubr.msk.bf16.vlgmr.msra.gmra.mrb[68].mxu1 %vm915_vm1, %v1745_v42  ;;  %v1049_v52 = vmax.f32 %v1023_v43, 0.0 }
 0x2f2   :  { %v1052_v49 = vmax.f32 %v1034_v45, 0.0  ;;  %2611 = vmatpush3.bf16.msra.mxu0 %v2755_v40  ;;  %2619 = vmatpush3.bf16.msra.mxu1 %v2756_v41 }
 0x2f3   :  { %v1050_v53 = vmax.f32 %v1026_v47, 0.0  ;;  %2612 = vmatprep.subr.bf16.mxu0 %v2787_v34  ;;  %2620 = vmatprep.subr.bf16.mxu1 %v2787_v34 }
 0x2f4   :  { %v1060_v31 = vpack.c.bf16 %v1052_v49, %v1051_v48  ;;  %2614 = vmatprep.mubr.msk.bf16.mxu0 %vm2788_vm2, %v2787_v34  ;;  %2622 = vmatprep.mubr.msk.bf16.mxu1 %vm2788_vm2, %v2787_v34 }
 0x2f5   :  { %v1059_v54 = vpack.c.bf16 %v1050_v53, %v1049_v52 }
 0x2f6   :  { %2613 = vmatpush3.bf16.msra.mxu0 %v2757_v50  ;;  %2621 = vmatpush3.bf16.msra.mxu1 %v2758_v51  ;;  %v1993_v60 = vrot.slane %v1060_v31, 4 }
 0x2f7   :  { %v1869_v57 = vrot.slane %v1059_v54, 4  ;;  %2626 = vmatprep.subr.bf16.mxu0 %v2787_v34  ;;  %2634 = vmatprep.subr.bf16.mxu1 %v2787_v34 }
 0x2f9   :  { %2615 = vmatmul.mubr.msk.bf16.vlgmr.msra.gmra.mrb[72].mxu0 %vm915_vm1, %v1059_v54  ;;  %2623 = vmatmul.mubr.msk.bf16.vlgmr.msra.gmra.mrb[72].mxu1 %vm915_vm1, %v1869_v57 }
 0x2fa   :  { %2627 = vmatpush3.bf16.msra.mxu0 %v2759_v55  ;;  %2635 = vmatpush3.bf16.msra.mxu1 %v2760_v56 }
 0x2fb   :  { %2628 = vmatprep.subr.bf16.mxu0 %v2787_v34  ;;  %2636 = vmatprep.subr.bf16.mxu1 %v2787_v34 }
 0x2fc   :  { %2630 = vmatprep.mubr.msk.bf16.mxu0 %vm2788_vm2, %v2787_v34  ;;  %2638 = vmatprep.mubr.msk.bf16.mxu1 %vm2788_vm2, %v2787_v34 }
 0x2fe   :  { %2629 = vmatpush3.bf16.msra.mxu0 %v2761_v58  ;;  %2637 = vmatpush3.bf16.msra.mxu1 %v2762_v59 }
 0x301   :  { %2631 = vmatmul.mubr.msk.bf16.vlgmr.msra.gmra.mrb[76].mxu0 %vm915_vm1, %v1060_v31  ;;  %2639 = vmatmul.mubr.msk.bf16.vlgmr.msra.gmra.mrb[76].mxu1 %vm915_vm1, %v1993_v60 }
 0x39a   :  { %v1176_v61 = vpop.f32.mrb[48].mxu1 }
 0x39b   :  { %v2528_v62 = vpop.f32.mrb[49].mxu1 }
 0x39c   :  { %v1121_v63 = vpop.f32.mrb[48].mxu0  ;;  %v1179_v0 = vpop.f32.mrb[50].mxu1 }
 0x39d   :  { %v1177_v1 = vadd.f32 %v1176_v61, %v1121_v63  ;;  %v2520_v2 = vpop.f32.mrb[49].mxu0  ;;  %v2529_v3 = vpop.f32.mrb[51].mxu1 }
 0x39e   :  { %v1124_v4 = vpop.f32.mrb[50].mxu0 }
 0x39f   :  { %v2521_v5 = vpop.f32.mrb[51].mxu0 }
 0x3a2   :  { %v1299_v6 = vpop.f32.mrb[52].mxu1 }
 0x3a3   :  { %v2544_v7 = vpop.f32.mrb[53].mxu1 }
 0x3a4   :  { %v1236_v9 = vpop.f32.mrb[52].mxu0  ;;  %v1302_v34 = vpop.f32.mrb[54].mxu1  ;;  %v2271_v7 = vld [vmem:[%s3328_s8] ss:$0 sm:$0xff] }
 0x3a5   :  { %v1242_v10 = vadd.f32 %v1236_v9, %v1177_v1  ;;  %v2536_v11 = vpop.f32.mrb[53].mxu0  ;;  %v2545_v12 = vpop.f32.mrb[55].mxu1 }
 0x3a6   :  { %v1239_v13 = vpop.f32.mrb[54].mxu0 }
 0x3a7   :  { %v2537_v14 = vpop.f32.mrb[55].mxu0  ;;  %v1305_v15 = vadd.f32 %v1299_v6, %v1242_v10 }
 0x3ac   :  { %v1360_v16 = vpop.f32.mrb[56].mxu0  ;;  %v1423_v17 = vpop.f32.mrb[56].mxu1 }
 0x3ad   :  { %v1366_v18 = vadd.f32 %v1360_v16, %v1305_v15  ;;  %v2552_v19 = vpop.f32.mrb[57].mxu0  ;;  %v2560_v20 = vpop.f32.mrb[57].mxu1 }
 0x3ae   :  { %v1363_v21 = vpop.f32.mrb[58].mxu0  ;;  %v1426_v22 = vpop.f32.mrb[58].mxu1 }
 0x3af   :  { %v1429_v23 = vadd.f32 %v1423_v17, %v1366_v18  ;;  %v2553_v24 = vpop.f32.mrb[59].mxu0  ;;  %v2561_v25 = vpop.f32.mrb[59].mxu1 }
 0x3b4   :  { %v1484_v26 = vpop.f32.mrb[60].mxu0  ;;  %v1547_v27 = vpop.f32.mrb[60].mxu1 }
 0x3b5   :  { %v1490_v28 = vadd.f32 %v1484_v26, %v1429_v23  ;;  %v2568_v29 = vpop.f32.mrb[61].mxu0  ;;  %v2576_v30 = vpop.f32.mrb[61].mxu1 }
 0x3b6   :  { %v1487_v32 = vpop.f32.mrb[62].mxu0  ;;  %v1550_v33 = vpop.f32.mrb[62].mxu1 }
 0x3b7   :  { %v1553_v8 = vadd.f32 %v1547_v27, %v1490_v28  ;;  %v2569_v35 = vpop.f32.mrb[63].mxu0  ;;  %v2577_v36 = vpop.f32.mrb[63].mxu1 }
 0x3bc   :  { %v1608_v37 = vpop.f32.mrb[64].mxu0  ;;  %v1671_v38 = vpop.f32.mrb[64].mxu1 }
 0x3bd   :  { %v1614_v39 = vadd.f32 %v1608_v37, %v1553_v8  ;;  %v2584_v40 = vpop.f32.mrb[65].mxu0  ;;  %v2592_v41 = vpop.f32.mrb[65].mxu1 }
 0x3be   :  { %v1611_v42 = vpop.f32.mrb[66].mxu0  ;;  %v1674_v43 = vpop.f32.mrb[66].mxu1 }
 0x3bf   :  { %v1677_v44 = vadd.f32 %v1671_v38, %v1614_v39  ;;  %v2585_v45 = vpop.f32.mrb[67].mxu0  ;;  %v2593_v46 = vpop.f32.mrb[67].mxu1 }
 0x3c4   :  { %v1732_v47 = vpop.f32.mrb[68].mxu0  ;;  %v1795_v48 = vpop.f32.mrb[68].mxu1 }
 0x3c5   :  { %v1738_v49 = vadd.f32 %v1732_v47, %v1677_v44  ;;  %v2600_v50 = vpop.f32.mrb[69].mxu0  ;;  %v2608_v51 = vpop.f32.mrb[69].mxu1 }
 0x3c6   :  { %v1735_v52 = vpop.f32.mrb[70].mxu0  ;;  %v1798_v53 = vpop.f32.mrb[70].mxu1 }
 0x3c7   :  { %v1801_v31 = vadd.f32 %v1795_v48, %v1738_v49  ;;  %v2601_v54 = vpop.f32.mrb[71].mxu0  ;;  %v2609_v55 = vpop.f32.mrb[71].mxu1 }
 0x3cc   :  { %v1856_v56 = vpop.f32.mrb[72].mxu0  ;;  %v1919_v57 = vpop.f32.mrb[72].mxu1 }
 0x3cd   :  { %v1862_v58 = vadd.f32 %v1856_v56, %v1801_v31  ;;  %v2616_v59 = vpop.f32.mrb[73].mxu0  ;;  %v2624_v60 = vpop.f32.mrb[73].mxu1 }
 0x3ce   :  { %v1859_v61 = vpop.f32.mrb[74].mxu0  ;;  %v1922_v62 = vpop.f32.mrb[74].mxu1 }
 0x3cf   :  { %v1925_v63 = vadd.f32 %v1919_v57, %v1862_v58  ;;  %v2617_v0 = vpop.f32.mrb[75].mxu0  ;;  %v2625_v1 = vpop.f32.mrb[75].mxu1 }
 0x3d4   :  { %v1980_v2 = vpop.f32.mrb[76].mxu0  ;;  %v2043_v3 = vpop.f32.mrb[76].mxu1 }
 0x3d5   :  { %v1986_v4 = vadd.f32 %v1980_v2, %v1925_v63  ;;  %v2632_v5 = vpop.f32.mrb[77].mxu0  ;;  %v2640_v6 = vpop.f32.mrb[77].mxu1 }
 0x3d6   :  { %v1983_v9 = vpop.f32.mrb[78].mxu0  ;;  %v2046_v34 = vpop.f32.mrb[78].mxu1 }
 0x3d7   :  { %v2049_v10 = vadd.f32 %v2043_v3, %v1986_v4  ;;  %v2633_v11 = vpop.f32.mrb[79].mxu0  ;;  %v2641_v12 = vpop.f32.mrb[79].mxu1 }
 0x3d9   :  { %v2057_v13 = vadd.f32 %v2271_v7, %v2049_v10 }
 0x3db   :  { %2059 = vst.msk [vmem:[#allocation2] sm:$0xff] %vm2058_vm3, %v2057_v13 }
 0x3dc   :  { %2774 = shalt.err (!%p2771_p4)
}
 0x3dd   :  { %s2775_s11 = scalar_lea.hbm %s3329_s9, 128 }
 0x3de   :  { %p2776_p5 = scmp.ne.s32.totalorder %s3329_s9, %s2775_s11  ;;  %p2779_p6 = scmp.lt.u32.totalorder %s2775_s11, %s3329_s9 }
 0x3e0   :  { %p2781_p7 = pnand %p2779_p6, %p2776_p5 }
 0x3e2   :  { %2784 = shalt.err (!%p2781_p7)
}
 0x3e3   :  { %2069 = dma.vmem_to_hbm [thread:$0]  %s2067_s29, 128, %s3329_s9, [#allocation3]  }
 0x3e4   :  { %2785 = dma.done.wait [#allocation3], 128  }
 0x3e5   :  { %2786 = vsyncadd [#allocation3], 4294967168 }
 0x3e6   :  { %2073 = vsyncpa [#allocation3], 1 }

</bundles_post_ra>
